<compile_context>
chip_gen: v7x
topology: tpu7x:2x2x1
jax: 0.10.0
libtpu: 0.0.40
codegen_flags: <defaults>
</compile_context>

<pallas_src>
import functools

import jax
import jax.numpy as jnp
from jax import lax
from jax.experimental import pallas as pl
from jax.experimental.pallas import tpu as pltpu


def _warp_kernel(band_start_ref, band_len_ref, base_ref, flow_ref, frame_ref,
                 out_ref, *, H, W, n_t):
    # band_start_ref: (B*n_t,) int32 SMEM  first source block of this tile's band
    # band_len_ref  : (B*n_t,) int32 SMEM  number of source blocks in the band
    # base_ref      : (2, T)               normalized base grid (hor, ver)
    # flow_ref      : (1, 2, T)            flow for this output tile
    # frame_ref     : (1, C, K)            source-pixel band block for this k step
    # out_ref       : (1, C, T) f32        output tile (resident accumulator)
    K = frame_ref.shape[2]
    b = pl.program_id(0)
    t = pl.program_id(1)
    k = pl.program_id(2)
    tile = b * n_t + t
    band_start = band_start_ref[tile]
    band_len = band_len_ref[tile]

    @pl.when(k == 0)
    def _():
        out_ref[...] = jnp.zeros_like(out_ref)

    @pl.when(k < band_len)
    def _():
        frame = frame_ref[0]                  # (C, K)
        flow = flow_ref[0]                    # (2, T)
        base = base_ref[...]                  # (2, T)

        # normalized sampling grid = base grid + scaled flow (matches module)
        gx = base[0:1, :] + flow[0:1, :] / ((W - 1.0) / 2.0)
        gy = base[1:2, :] + flow[1:2, :] / ((H - 1.0) / 2.0)

        # unnormalize, align_corners=False:  x = ((g + 1) * size - 1) / 2
        x = ((gx + 1.0) * W - 1.0) * 0.5      # (1, T)
        y = ((gy + 1.0) * H - 1.0) * 0.5      # (1, T)

        x0f = jnp.floor(x)
        y0f = jnp.floor(y)
        wx1 = x - x0f
        wx0 = 1.0 - wx1
        wy1 = y - y0f
        wy0 = 1.0 - wy1

        x0 = x0f.astype(jnp.int32)
        y0 = y0f.astype(jnp.int32)

        # zeros padding: out-of-bounds corners contribute nothing
        vx0 = (x0 >= 0) & (x0 <= W - 1)
        vx1 = (x0 + 1 >= 0) & (x0 + 1 <= W - 1)
        vy0 = (y0 >= 0) & (y0 <= H - 1)
        vy1 = (y0 + 1 >= 0) & (y0 + 1 <= H - 1)

        w00 = jnp.where(vx0 & vy0, wx0 * wy0, 0.0)   # (1, T)
        w01 = jnp.where(vx1 & vy0, wx1 * wy0, 0.0)
        w10 = jnp.where(vx0 & vy1, wx0 * wy1, 0.0)
        w11 = jnp.where(vx1 & vy1, wx1 * wy1, 0.0)

        # single floor/int chain; other corners derived (+1, +W, +W+1).
        k0 = (band_start + k) * K
        idx00 = y0 * W + x0 - k0                     # (1, T) local source idx
        q = lax.broadcasted_iota(jnp.int32, (K, 1), 0)   # (K, 1) sublane iota

        # fused weighted selection matrix: one MXU pass for all four corners
        sel = (jnp.where(q == idx00, w00, 0.0)
               + jnp.where(q == idx00 + 1, w01, 0.0)
               + jnp.where(q == idx00 + W, w10, 0.0)
               + jnp.where(q == idx00 + (W + 1), w11, 0.0))   # (K, T)

        out_ref[0] += jnp.dot(frame, sel, preferred_element_type=jnp.float32)


def _round_up(x, m):
    return ((x + m - 1) // m) * m


def _pick_tile(hw_pad, cap):
    """Largest tile <= cap that is a multiple of 256 and divides hw_pad."""
    t = max(256, (min(cap, hw_pad) // 256) * 256)
    while hw_pad % t != 0:
        t -= 256
    return t


def warp(frame, flow, *, out_tile_cap=512, src_tile_cap=2048):
    """frame: (B, C, H, W); flow: (B, 2, H, W)  ->  warped frame (B, C, H, W)."""
    B, C, H, W = frame.shape
    assert flow.shape == (B, 2, H, W)
    assert H > 1 and W > 1, "degenerate H/W==1 not supported (div by size-1)"
    HW = H * W
    HW_pad = _round_up(HW, 256)
    pad = HW_pad - HW

    frame_flat = frame.reshape(B, C, HW).astype(jnp.float32)
    flow_flat = flow.reshape(B, 2, HW).astype(jnp.float32)

    # Base normalized grid (hor along W, ver along H), flattened to (2, HW).
    col = jnp.arange(W, dtype=jnp.float32)
    row = jnp.arange(H, dtype=jnp.float32)
    hor = jnp.broadcast_to((-1.0 + 2.0 * col / (W - 1.0))[None, :], (H, W))
    ver = jnp.broadcast_to((-1.0 + 2.0 * row / (H - 1.0))[:, None], (H, W))
    base = jnp.stack([hor.reshape(HW), ver.reshape(HW)], axis=0)   # (2, HW)

    if pad:
        frame_flat = jnp.pad(frame_flat, ((0, 0), (0, 0), (0, pad)))
        flow_flat = jnp.pad(flow_flat, ((0, 0), (0, 0), (0, pad)))
        base = jnp.pad(base, ((0, 0), (0, pad)))

    T = _pick_tile(HW_pad, out_tile_cap)     # output-pixel tile (lane-dense)
    K = _pick_tile(HW_pad, src_tile_cap)     # source-pixel reduction tile
    n_t = HW_pad // T
    if B * n_t < 2 and T > 256:              # keep >=2 parallel units (v7x 2 TCs)
        T = _pick_tile(HW_pad, T // 2)
        n_t = HW_pad // T
    n_k = HW_pad // K

    # ---- per-(batch, output-tile) source row band (scalar prefetch) ----
    # Same arithmetic as the kernel, +/-1 row of slack for rounding safety.
    gy = base[1][None, :] + flow_flat[:, 1, :] / ((H - 1.0) / 2.0)  # (B, HW_pad)
    y = ((gy + 1.0) * H - 1.0) * 0.5
    y0f = jnp.floor(y)
    lo = jnp.clip(y0f - 1.0, 0.0, H - 1.0)
    hi = jnp.clip(y0f + 2.0, 0.0, H - 1.0)
    lo_t = lo.reshape(B, n_t, T).min(axis=2).astype(jnp.int32)      # (B, n_t)
    hi_t = hi.reshape(B, n_t, T).max(axis=2).astype(jnp.int32)
    band_start = (lo_t * W) // K
    band_end = ((hi_t + 1) * W - 1) // K
    band_len = band_end - band_start + 1
    band_start = band_start.reshape(-1).astype(jnp.int32)           # (B*n_t,)
    band_len = band_len.reshape(-1).astype(jnp.int32)               # (B*n_t,)

    kernel = functools.partial(_warp_kernel, H=H, W=W, n_t=n_t)

    def base_map(b, t, k, bs, bl):
        return (0, t)

    def flow_map(b, t, k, bs, bl):
        return (b, 0, t)

    def frame_map(b, t, k, bs, bl):
        i = b * n_t + t
        # clamp to the band so out-of-band steps re-use the same block (no DMA)
        return (b, 0, bs[i] + jnp.minimum(k, bl[i] - 1))

    def out_map(b, t, k, bs, bl):
        return (b, 0, t)

    out_flat = pl.pallas_call(
        kernel,
        out_shape=jax.ShapeDtypeStruct((B, C, HW_pad), jnp.float32),
        grid_spec=pltpu.PrefetchScalarGridSpec(
            num_scalar_prefetch=2,
            grid=(B, n_t, n_k),
            in_specs=[
                pl.BlockSpec((2, T), base_map),          # base grid
                pl.BlockSpec((1, 2, T), flow_map),       # flow
                pl.BlockSpec((1, C, K), frame_map),      # frame band (data-dep)
            ],
            out_specs=pl.BlockSpec((1, C, T), out_map),
        ),
        compiler_params=pltpu.CompilerParams(
            dimension_semantics=("parallel", "parallel", "arbitrary"),
            vmem_limit_bytes=48 << 20),
    )(band_start, band_len, base, flow_flat, frame_flat)

    out = out_flat[:, :, :HW].reshape(B, C, H, W)
    return out.astype(frame.dtype)


def _warp_reference(frame, flow):
    """Pure-JAX reference with identical grid_sample semantics."""
    B, C, H, W = frame.shape
    col = jnp.arange(W, dtype=jnp.float32)
    row = jnp.arange(H, dtype=jnp.float32)
    hor = (-1.0 + 2.0 * col / (W - 1.0))[None, None, :]    # (1,1,W)
    ver = (-1.0 + 2.0 * row / (H - 1.0))[None, :, None]    # (1,H,1)
    gx = hor + flow[:, 0] / ((W - 1.0) / 2.0)              # (B,H,W)
    gy = ver + flow[:, 1] / ((H - 1.0) / 2.0)
    x = ((gx + 1.0) * W - 1.0) * 0.5
    y = ((gy + 1.0) * H - 1.0) * 0.5
    x0 = jnp.floor(x); x1 = x0 + 1.0
    y0 = jnp.floor(y); y1 = y0 + 1.0
    wx1 = x - x0; wx0 = 1.0 - wx1
    wy1 = y - y0; wy0 = 1.0 - wy1

    def gather(xc, yc, w):
        inb = (xc >= 0) & (xc <= W - 1) & (yc >= 0) & (yc <= H - 1)
        w = jnp.where(inb, w, 0.0)
        xi = jnp.clip(xc, 0, W - 1).astype(jnp.int32)
        yi = jnp.clip(yc, 0, H - 1).astype(jnp.int32)
        idx = yi * W + xi                                  # (B,H,W)
        frame_flat = frame.reshape(B, C, H * W)
        vals = jnp.take_along_axis(
            frame_flat, idx.reshape(B, 1, H * W), axis=2)
        return vals.reshape(B, C, H, W) * w[:, None, :, :]

    return (gather(x0, y0, wx0 * wy0) + gather(x1, y0, wx1 * wy0)
            + gather(x0, y1, wx0 * wy1) + gather(x1, y1, wx1 * wy1))


if __name__ == "__main__":
    key = jax.random.PRNGKey(0)
    k1, k2 = jax.random.split(key)
    B, C, H, W = 2, 3, 16, 16
    frame = jax.random.normal(k1, (B, C, H, W), dtype=jnp.float32)
    flow = 3.0 * jax.random.normal(k2, (B, 2, H, W), dtype=jnp.float32)

    out = warp(frame, flow)
    jax.block_until_ready(out)

    ref = _warp_reference(frame, flow)
    import numpy as np
    np.testing.assert_allclose(np.asarray(out), np.asarray(ref),
                               rtol=1e-5, atol=1e-5)
    print("KERNEL_OK")
</pallas_src>

<mosaic_0001>
module attributes {stable_mosaic.version = 11 : i64} {
  func.func @_warp_kernel(%arg0: i32, %arg1: i32, %arg2: i32, %arg3: memref<2xi32, #tpu.memory_space<smem>>, %arg4: memref<2xi32, #tpu.memory_space<smem>>, %arg5: memref<2x256xf32, #tpu.memory_space<vmem>>, %arg6: memref<1x2x256xf32, #tpu.memory_space<vmem>>, %arg7: memref<1x3x256xf32, #tpu.memory_space<vmem>>, %arg8: memref<1x3x256xf32, #tpu.memory_space<vmem>>) attributes {dimension_semantics = [#tpu.dimension_semantics<parallel>, #tpu.dimension_semantics<parallel>, #tpu.dimension_semantics<arbitrary>], iteration_bounds = array<i64: 2, 1, 1>, scalar_prefetch = 2 : i64, scratch_operands = 0 : i64, tpu.core_type = #tpu.core_type<tc>, window_params = [{transform_indices = @transform_0, window_bounds = array<i64: 2, 256>}, {transform_indices = @transform_1, window_bounds = array<i64: 1, 2, 256>}, {transform_indices = @transform_2, window_bounds = array<i64: 1, 3, 256>}, {transform_indices = @transform_3, window_bounds = array<i64: 1, 3, 256>}]} {
    %c1_i32 = arith.constant 1 : i32
    %0 = arith.muli %arg0, %c1_i32 : i32
    %1 = arith.addi %0, %arg1 : i32
    %2 = arith.index_cast %1 : i32 to index
    %3 = memref.load %arg3[%2] : memref<2xi32, #tpu.memory_space<smem>>
    %4 = arith.index_cast %1 : i32 to index
    %5 = memref.load %arg4[%4] : memref<2xi32, #tpu.memory_space<smem>>
    %c0_i32 = arith.constant 0 : i32
    %6 = arith.cmpi eq, %arg2, %c0_i32 : i32
    %7 = arith.extui %6 : i1 to i32
    %c0_i32_0 = arith.constant 0 : i32
    %8 = arith.cmpi ne, %7, %c0_i32_0 : i32
    scf.if %8 {
      %cst = arith.constant 0.000000e+00 : f32
      %12 = vector.broadcast %cst : f32 to vector<1x3x256xf32>
      %c0 = arith.constant 0 : index
      %c0_2 = arith.constant 0 : index
      %c0_3 = arith.constant 0 : index
      %13 = vector.load %arg8[%c0, %c0_2, %c0_3] : memref<1x3x256xf32, #tpu.memory_space<vmem>>, vector<1x3x256xf32>
      tpu.vector_store %arg8[%c0, %c0_2, %c0_3], %12 {strides = array<i32>} : memref<1x3x256xf32, #tpu.memory_space<vmem>>, vector<1x3x256xf32>,
    } else {
    }
    %9 = arith.cmpi slt, %arg2, %5 : i32
    %10 = arith.extui %9 : i1 to i32
    %c0_i32_1 = arith.constant 0 : i32
    %11 = arith.cmpi ne, %10, %c0_i32_1 : i32
    scf.if %11 {
      %c0 = arith.constant 0 : index
      %c0_2 = arith.constant 0 : index
      %c0_3 = arith.constant 0 : index
      %12 = vector.load %arg7[%c0, %c0_2, %c0_3] : memref<1x3x256xf32, #tpu.memory_space<vmem>>, vector<1x3x256xf32>
      %13 = vector.shape_cast %12 : vector<1x3x256xf32> to vector<3x256xf32>
      %c0_4 = arith.constant 0 : index
      %c0_5 = arith.constant 0 : index
      %c0_6 = arith.constant 0 : index
      %14 = vector.load %arg6[%c0_4, %c0_5, %c0_6] : memref<1x2x256xf32, #tpu.memory_space<vmem>>, vector<1x2x256xf32>
      %15 = vector.shape_cast %14 : vector<1x2x256xf32> to vector<2x256xf32>
      %c0_7 = arith.constant 0 : index
      %c0_8 = arith.constant 0 : index
      %16 = vector.load %arg5[%c0_7, %c0_8] : memref<2x256xf32, #tpu.memory_space<vmem>>, vector<2x256xf32>
      %17 = vector.extract_strided_slice %16 {offsets = [0, 0], sizes = [1, 256], strides = [1, 1]} : vector<2x256xf32> to vector<1x256xf32>
      %18 = vector.extract_strided_slice %15 {offsets = [0, 0], sizes = [1, 256], strides = [1, 1]} : vector<2x256xf32> to vector<1x256xf32>
      %cst = arith.constant 7.500000e+00 : f32
      %19 = vector.broadcast %cst : f32 to vector<1x256xf32>
      %20 = arith.divf %18, %19 : vector<1x256xf32>
      %21 = arith.addf %17, %20 : vector<1x256xf32>
      %22 = vector.extract_strided_slice %16 {offsets = [1, 0], sizes = [1, 256], strides = [1, 1]} : vector<2x256xf32> to vector<1x256xf32>
      %23 = vector.extract_strided_slice %15 {offsets = [1, 0], sizes = [1, 256], strides = [1, 1]} : vector<2x256xf32> to vector<1x256xf32>
      %cst_9 = arith.constant 7.500000e+00 : f32
      %24 = vector.broadcast %cst_9 : f32 to vector<1x256xf32>
      %25 = arith.divf %23, %24 : vector<1x256xf32>
      %26 = arith.addf %22, %25 : vector<1x256xf32>
      %cst_10 = arith.constant 1.000000e+00 : f32
      %27 = vector.broadcast %cst_10 : f32 to vector<1x256xf32>
      %28 = arith.addf %21, %27 : vector<1x256xf32>
      %cst_11 = arith.constant 1.600000e+01 : f32
      %29 = vector.broadcast %cst_11 : f32 to vector<1x256xf32>
      %30 = arith.mulf %28, %29 : vector<1x256xf32>
      %cst_12 = arith.constant 1.000000e+00 : f32
      %31 = vector.broadcast %cst_12 : f32 to vector<1x256xf32>
      %32 = arith.subf %30, %31 : vector<1x256xf32>
      %cst_13 = arith.constant 5.000000e-01 : f32
      %33 = vector.broadcast %cst_13 : f32 to vector<1x256xf32>
      %34 = arith.mulf %32, %33 : vector<1x256xf32>
      %cst_14 = arith.constant 1.000000e+00 : f32
      %35 = vector.broadcast %cst_14 : f32 to vector<1x256xf32>
      %36 = arith.addf %26, %35 : vector<1x256xf32>
      %cst_15 = arith.constant 1.600000e+01 : f32
      %37 = vector.broadcast %cst_15 : f32 to vector<1x256xf32>
      %38 = arith.mulf %36, %37 : vector<1x256xf32>
      %cst_16 = arith.constant 1.000000e+00 : f32
      %39 = vector.broadcast %cst_16 : f32 to vector<1x256xf32>
      %40 = arith.subf %38, %39 : vector<1x256xf32>
      %cst_17 = arith.constant 5.000000e-01 : f32
      %41 = vector.broadcast %cst_17 : f32 to vector<1x256xf32>
      %42 = arith.mulf %40, %41 : vector<1x256xf32>
      %43 = math.floor %34 : vector<1x256xf32>
      %44 = math.floor %42 : vector<1x256xf32>
      %45 = arith.subf %34, %43 : vector<1x256xf32>
      %cst_18 = arith.constant 1.000000e+00 : f32
      %46 = vector.broadcast %cst_18 : f32 to vector<1x256xf32>
      %47 = arith.subf %46, %45 : vector<1x256xf32>
      %48 = arith.subf %42, %44 : vector<1x256xf32>
      %cst_19 = arith.constant 1.000000e+00 : f32
      %49 = vector.broadcast %cst_19 : f32 to vector<1x256xf32>
      %50 = arith.subf %49, %48 : vector<1x256xf32>
      %51 = arith.fptosi %43 : vector<1x256xf32> to vector<1x256xi32>
      %52 = arith.fptosi %44 : vector<1x256xf32> to vector<1x256xi32>
      %c0_i32_20 = arith.constant 0 : i32
      %53 = vector.broadcast %c0_i32_20 : i32 to vector<1x256xi32>
      %54 = arith.cmpi sge, %51, %53 : vector<1x256xi32>
      %c15_i32 = arith.constant 15 : i32
      %55 = vector.broadcast %c15_i32 : i32 to vector<1x256xi32>
      %56 = arith.cmpi sle, %51, %55 : vector<1x256xi32>
      %57 = arith.andi %54, %56 : vector<1x256xi1>
      %c1_i32_21 = arith.constant 1 : i32
      %58 = vector.broadcast %c1_i32_21 : i32 to vector<1x256xi32>
      %59 = arith.addi %51, %58 : vector<1x256xi32>
      %c0_i32_22 = arith.constant 0 : i32
      %60 = vector.broadcast %c0_i32_22 : i32 to vector<1x256xi32>
      %61 = arith.cmpi sge, %59, %60 : vector<1x256xi32>
      %c1_i32_23 = arith.constant 1 : i32
      %62 = vector.broadcast %c1_i32_23 : i32 to vector<1x256xi32>
      %63 = arith.addi %51, %62 : vector<1x256xi32>
      %c15_i32_24 = arith.constant 15 : i32
      %64 = vector.broadcast %c15_i32_24 : i32 to vector<1x256xi32>
      %65 = arith.cmpi sle, %63, %64 : vector<1x256xi32>
      %66 = arith.andi %61, %65 : vector<1x256xi1>
      %c0_i32_25 = arith.constant 0 : i32
      %67 = vector.broadcast %c0_i32_25 : i32 to vector<1x256xi32>
      %68 = arith.cmpi sge, %52, %67 : vector<1x256xi32>
      %c15_i32_26 = arith.constant 15 : i32
      %69 = vector.broadcast %c15_i32_26 : i32 to vector<1x256xi32>
      %70 = arith.cmpi sle, %52, %69 : vector<1x256xi32>
      %71 = arith.andi %68, %70 : vector<1x256xi1>
      %c1_i32_27 = arith.constant 1 : i32
      %72 = vector.broadcast %c1_i32_27 : i32 to vector<1x256xi32>
      %73 = arith.addi %52, %72 : vector<1x256xi32>
      %c0_i32_28 = arith.constant 0 : i32
      %74 = vector.broadcast %c0_i32_28 : i32 to vector<1x256xi32>
      %75 = arith.cmpi sge, %73, %74 : vector<1x256xi32>
      %c1_i32_29 = arith.constant 1 : i32
      %76 = vector.broadcast %c1_i32_29 : i32 to vector<1x256xi32>
      %77 = arith.addi %52, %76 : vector<1x256xi32>
      %c15_i32_30 = arith.constant 15 : i32
      %78 = vector.broadcast %c15_i32_30 : i32 to vector<1x256xi32>
      %79 = arith.cmpi sle, %77, %78 : vector<1x256xi32>
      %80 = arith.andi %75, %79 : vector<1x256xi1>
      %81 = arith.andi %57, %71 : vector<1x256xi1>
      %82 = arith.mulf %47, %50 : vector<1x256xf32>
      %cst_31 = arith.constant 0.000000e+00 : f32
      %83 = vector.broadcast %cst_31 : f32 to vector<1x256xf32>
      %84 = arith.select %81, %82, %83 : vector<1x256xi1>, vector<1x256xf32>
      %85 = arith.andi %66, %71 : vector<1x256xi1>
      %86 = arith.mulf %45, %50 : vector<1x256xf32>
      %cst_32 = arith.constant 0.000000e+00 : f32
      %87 = vector.broadcast %cst_32 : f32 to vector<1x256xf32>
      %88 = arith.select %85, %86, %87 : vector<1x256xi1>, vector<1x256xf32>
      %89 = arith.andi %57, %80 : vector<1x256xi1>
      %90 = arith.mulf %47, %48 : vector<1x256xf32>
      %cst_33 = arith.constant 0.000000e+00 : f32
      %91 = vector.broadcast %cst_33 : f32 to vector<1x256xf32>
      %92 = arith.select %89, %90, %91 : vector<1x256xi1>, vector<1x256xf32>
      %93 = arith.andi %66, %80 : vector<1x256xi1>
      %94 = arith.mulf %45, %48 : vector<1x256xf32>
      %cst_34 = arith.constant 0.000000e+00 : f32
      %95 = vector.broadcast %cst_34 : f32 to vector<1x256xf32>
      %96 = arith.select %93, %94, %95 : vector<1x256xi1>, vector<1x256xf32>
      %97 = arith.addi %3, %arg2 : i32
      %c256_i32 = arith.constant 256 : i32
      %98 = arith.muli %97, %c256_i32 : i32
      %c16_i32 = arith.constant 16 : i32
      %99 = vector.broadcast %c16_i32 : i32 to vector<1x256xi32>
      %100 = arith.muli %52, %99 : vector<1x256xi32>
      %101 = arith.addi %100, %51 : vector<1x256xi32>
      %102 = vector.broadcast %98 : i32 to vector<1x256xi32>
      %103 = arith.subi %101, %102 : vector<1x256xi32>
      %104 = tpu.iota {dimensions = array<i32: 0>} : vector<256x1xi32>
      %105 = vector.broadcast %104 : vector<256x1xi32> to vector<256x256xi32>
      %106 = vector.broadcast %103 : vector<1x256xi32> to vector<256x256xi32>
      %107 = arith.cmpi eq, %105, %106 : vector<256x256xi32>
      %cst_35 = arith.constant 0.000000e+00 : f32
      %108 = vector.shape_cast %84 : vector<1x256xf32> to vector<1x256xf32>
      %109 = vector.broadcast %108 : vector<1x256xf32> to vector<256x256xf32>
      %110 = vector.broadcast %cst_35 : f32 to vector<256x256xf32>
      %111 = arith.select %107, %109, %110 : vector<256x256xi1>, vector<256x256xf32>
      %c1_i32_36 = arith.constant 1 : i32
      %112 = vector.broadcast %c1_i32_36 : i32 to vector<1x256xi32>
      %113 = arith.addi %103, %112 : vector<1x256xi32>
      %114 = vector.broadcast %104 : vector<256x1xi32> to vector<256x256xi32>
      %115 = vector.broadcast %113 : vector<1x256xi32> to vector<256x256xi32>
      %116 = arith.cmpi eq, %114, %115 : vector<256x256xi32>
      %cst_37 = arith.constant 0.000000e+00 : f32
      %117 = vector.shape_cast %88 : vector<1x256xf32> to vector<1x256xf32>
      %118 = vector.broadcast %117 : vector<1x256xf32> to vector<256x256xf32>
      %119 = vector.broadcast %cst_37 : f32 to vector<256x256xf32>
      %120 = arith.select %116, %118, %119 : vector<256x256xi1>, vector<256x256xf32>
      %121 = arith.addf %111, %120 : vector<256x256xf32>
      %c16_i32_38 = arith.constant 16 : i32
      %122 = vector.broadcast %c16_i32_38 : i32 to vector<1x256xi32>
      %123 = arith.addi %103, %122 : vector<1x256xi32>
      %124 = vector.broadcast %104 : vector<256x1xi32> to vector<256x256xi32>
      %125 = vector.broadcast %123 : vector<1x256xi32> to vector<256x256xi32>
      %126 = arith.cmpi eq, %124, %125 : vector<256x256xi32>
      %cst_39 = arith.constant 0.000000e+00 : f32
      %127 = vector.shape_cast %92 : vector<1x256xf32> to vector<1x256xf32>
      %128 = vector.broadcast %127 : vector<1x256xf32> to vector<256x256xf32>
      %129 = vector.broadcast %cst_39 : f32 to vector<256x256xf32>
      %130 = arith.select %126, %128, %129 : vector<256x256xi1>, vector<256x256xf32>
      %131 = arith.addf %121, %130 : vector<256x256xf32>
      %c17_i32 = arith.constant 17 : i32
      %132 = vector.broadcast %c17_i32 : i32 to vector<1x256xi32>
      %133 = arith.addi %103, %132 : vector<1x256xi32>
      %134 = vector.broadcast %104 : vector<256x1xi32> to vector<256x256xi32>
      %135 = vector.broadcast %133 : vector<1x256xi32> to vector<256x256xi32>
      %136 = arith.cmpi eq, %134, %135 : vector<256x256xi32>
      %cst_40 = arith.constant 0.000000e+00 : f32
      %137 = vector.shape_cast %96 : vector<1x256xf32> to vector<1x256xf32>
      %138 = vector.broadcast %137 : vector<1x256xf32> to vector<256x256xf32>
      %139 = vector.broadcast %cst_40 : f32 to vector<256x256xf32>
      %140 = arith.select %136, %138, %139 : vector<256x256xi1>, vector<256x256xf32>
      %141 = arith.addf %131, %140 : vector<256x256xf32>
      %c0_41 = arith.constant 0 : index
      %c0_42 = arith.constant 0 : index
      %c0_43 = arith.constant 0 : index
      %142 = vector.load %arg8[%c0_41, %c0_42, %c0_43] : memref<1x3x256xf32, #tpu.memory_space<vmem>>, vector<1x3x256xf32>
      %143 = vector.shape_cast %142 : vector<1x3x256xf32> to vector<3x256xf32>
      %cst_44 = arith.constant dense<0.000000e+00> : vector<3x256xf32>
      %144 = tpu.matmul %13, %141, %cst_44 {dimension_numbers = #tpu.dot_dimension_numbers<[1], [0], [0], [1], [0, 0, 1, 1], [], []>} : vector<3x256xf32>, vector<256x256xf32>, vector<3x256xf32> -> vector<3x256xf32>
      %145 = arith.addf %143, %144 : vector<3x256xf32>
      %c0_45 = arith.constant 0 : index
      %c0_46 = arith.constant 0 : index
      %c0_47 = arith.constant 0 : index
      %146 = vector.load %arg8[%c0_45, %c0_46, %c0_47] : memref<1x3x256xf32, #tpu.memory_space<vmem>>, vector<1x3x256xf32>
      %147 = vector.shape_cast %146 : vector<1x3x256xf32> to vector<3x256xf32>
      %148 = vector.shape_cast %145 : vector<3x256xf32> to vector<1x3x256xf32>
      tpu.vector_store %arg8[%c0_45, %c0_46, %c0_47], %148 {strides = array<i32>} : memref<1x3x256xf32, #tpu.memory_space<vmem>>, vector<1x3x256xf32>,
    } else {
    }
    return
  }
  func.func @transform_0(%arg0: i32, %arg1: i32, %arg2: i32, %arg3: memref<2xi32, #tpu.memory_space<smem>>, %arg4: memref<2xi32, #tpu.memory_space<smem>>) -> (i32, i32) {
    %c0_i32 = arith.constant 0 : i32
    %c0_i32_0 = arith.constant 0 : i32
    return %c0_i32, %arg1 : i32, i32
  }
  func.func @transform_1(%arg0: i32, %arg1: i32, %arg2: i32, %arg3: memref<2xi32, #tpu.memory_space<smem>>, %arg4: memref<2xi32, #tpu.memory_space<smem>>) -> (i32, i32, i32) {
    %c0_i32 = arith.constant 0 : i32
    %c0_i32_0 = arith.constant 0 : i32
    return %arg0, %c0_i32, %arg1 : i32, i32, i32
  }
  func.func @transform_2(%arg0: i32, %arg1: i32, %arg2: i32, %arg3: memref<2xi32, #tpu.memory_space<smem>>, %arg4: memref<2xi32, #tpu.memory_space<smem>>) -> (i32, i32, i32) {
    %c1_i32 = arith.constant 1 : i32
    %0 = arith.muli %arg0, %c1_i32 : i32
    %1 = arith.addi %0, %arg1 : i32
    %2 = arith.index_cast %1 : i32 to index
    %3 = memref.load %arg3[%2] : memref<2xi32, #tpu.memory_space<smem>>
    %4 = arith.index_cast %1 : i32 to index
    %5 = memref.load %arg4[%4] : memref<2xi32, #tpu.memory_space<smem>>
    %c1_i32_0 = arith.constant 1 : i32
    %6 = arith.subi %5, %c1_i32_0 : i32
    %7 = arith.minsi %arg2, %6 : i32
    %8 = arith.addi %3, %7 : i32
    %c0_i32 = arith.constant 0 : i32
    %c0_i32_1 = arith.constant 0 : i32
    return %arg0, %c0_i32, %8 : i32, i32, i32
  }
  func.func @transform_3(%arg0: i32, %arg1: i32, %arg2: i32, %arg3: memref<2xi32, #tpu.memory_space<smem>>, %arg4: memref<2xi32, #tpu.memory_space<smem>>) -> (i32, i32, i32) {
    %c0_i32 = arith.constant 0 : i32
    %c0_i32_0 = arith.constant 0 : i32
    return %arg0, %c0_i32, %arg1 : i32, i32, i32
  }
}

</mosaic_0001>

<bundles_post_ra>
// kernel: tpu_custom_call.1
= control target key start
LH: loop header
LB: loop body
LE: loop exit
PB: predicated region body
PF: predicated region fallthrough
CT: control target
= control target key end

     0   :  { %s2627_s0 = inlined_call_operand.vmem [shape: s32[2], index: 0, kind: input, shape index: {}]   ;;  %s2628_s2 = inlined_call_operand.vmem [shape: f32[2,256], index: 2, kind: input, shape index: {}]   ;;  %s2629_s3 = inlined_call_operand.vmem [shape: f32[2,2,256], index: 3, kind: input, shape index: {}]   ;;  %s2630_s4 = inlined_call_operand.vmem [shape: f32[2,3,256], index: 4, kind: input, shape index: {}]   ;;  %s2631_s5 = inlined_call_operand.vmem [shape: f32[2,3,256], index: 5, kind: output, shape index: {}]   ;;  %s2632_s1 = inlined_call_operand.vmem [shape: s32[2], index: 1, kind: input, shape index: {}]  }
   0x1   :  { %s10_s20 = sshll.u32 %s2627_s0, 4  ;;  %s14_s23 = sshll.u32 %s2632_s1, 4  ;;  %s11_s20 = int_to_ptr.vmem [resolvable:$true] %s10_s20  ;;  %s15_s23 = int_to_ptr.vmem [resolvable:$true] %s14_s23 }
   0x2   :  { %s1612_s24 = scalar_lea.vmem %s11_s20, 16  ;;  %p1617_p1 = scmp.lt.s32.totalorder %s11_s20, %s11_s20 }
   0x3   :  { %p1613_p0 = scmp.ne.s32.totalorder %s11_s20, %s1612_s24  ;;  %p1618_p2 = scmp.lt.s32.totalorder %s1612_s24, %s1612_s24 }
   0x5   :  { %p1619_p3 = por %p1618_p2, %p1617_p1 }
   0x7   :  { %p1620_p4 = pnand %p1619_p3, %p1613_p0 }
   0x9   :  { %1623 = shalt.err (!%p1620_p4)  }
   0xa   :  { %s1662_s25 = smov [#allocation3]   ;;  %s1624_s26 = scalar_lea.vmem %s15_s23, 16 }
   0xb   :  { %13 = dma.vmem_to_smem %s11_s20, 16, %s1662_s25, [#allocation2] }
   0xc   :  { %p1625_p5 = scmp.ne.s32.totalorder %s15_s23, %s1624_s26  ;;  %p1629_p6 = scmp.lt.s32.totalorder %s15_s23, %s15_s23 }
   0xd   :  { %p1630_p7 = scmp.lt.s32.totalorder %s1624_s26, %s1624_s26 }
   0xf   :  { %p1631_p8 = por %p1630_p7, %p1629_p6 }
  0x11   :  { %p1632_p9 = pnand %p1631_p8, %p1625_p5 }
  0x13   :  { %1635 = shalt.err (!%p1632_p9)  }
  0x14   :  { %s1663_s0 = smov [#allocation4]  }
  0x15   :  { %17 = dma.vmem_to_smem %s15_s23, 16, %s1663_s0, [#allocation2] }
  0x16   :  { %1648 = dma.done.wait [#allocation2], 32 }
  0x17   :  { %1649 = vsyncadd [#allocation2], 4294967264 }
  0x18   :  { %19 = sfence }
  0x19   :  { %s1702_s1 = smov 0   ;;  %s1704_s27 = smov 0  }
  0x1a   :  { %s1706_s28 = smov 0  }
  0x1b LB: > { %s44_s29 = sadd.s32 1, %s1656_s27  ;;  %p1497_p10 = scmp.ge.s32.totalorder %s1660_s28, 1  ;;  %s1660_s28 = sphi %s1706_s28, %s25_s28   ;;  %s1656_s27 = sphi %s1704_s27, %s2638_s27   ;;  %s1652_s1 = sphi %s1702_s1, %s2637_s1  }
  0x1c   : > { %p46_p11 = scmp.ge.s32.totalorder %s44_s29, 2  ;;  %p233_p12 = scmp.lt.s32.totalorder %s1660_s28, 3 }
  0x1e   : > { %s2640_s29 = smov (%p46_p11, %s44_s29), 0  ;;  %p234_p13 = pnand %p1497_p10, %p233_p12 }
  0x1f   : > { %p293_p0 = scmp.lt.s32.totalorder (!%p234_p13), %s1652_s1, 1  ;;  %s304_s30 = sld [smem:[#allocation4 + %s1652_s1]] (!%p234_p13)  ;;  %v1664_v0 = vmov (!%p234_p13), 0.0  }
  0x20   : > { %237 = sbr.rel (%p234_p13) target bundleno = 491 (0x1eb), region = 32  ;;  %s1720_s6 = sld [smem:[#allocation3 + %s1652_s1]] (!%p234_p13) }
  0x21   : > { %s338_s8 = sld [smem:[#allocation4 + %s1652_s1]] (!%p234_p13) }
  0x22   : > { %s303_s10 = sld [smem:[#allocation3 + %s1652_s1]] (!%p234_p13) }
  0x25   : > { %s1500_s18 = sadd.s32 (!%p234_p13), 4294967295, %s304_s30 }
  0x26   : > { %p1501_p1 = scmp.gt.s32.totalorder (!%p234_p13), %s1500_s18, 0 }
  0x27   : > { %s294_s7 = scalar_select %p293_p0, %s1652_s1, 1 }
  0x28   : > { %s2642_s18 = smov (%p1501_p1, %s1500_s18), 0  ;;  %p1508_p3 = scmp.le.s32.totalorder %s338_s8, 0 }
  0x29   : > { %s1515_s9 = sshll.u32 %s294_s7, 2  ;;  %s1516_s14 = sshll.u32 %s294_s7, 3  ;;  %v350_v2 = vld [vmem:[%s2628_s2] sm:$0xf] (!%p1508_p3)  ;;  %v404_v6 = vlaneseq (!%p1508_p3)  ;;  %v1665_v43 = vmov (!%p1508_p3), 0  }
  0x2a   : > { %s300_s13 = scalar_lea.vmem %s2629_s3, %s1515_s9  ;;  %s1728_s17 = scalar_lea.vmem %s2631_s5, %s1516_s14 }
  0x2b   : > { %343 = vst [vmem:[%s1728_s17] sm:$0x77] %v1664_v0  ;;  %s308_s19 = sadd.s32 %s2642_s18, %s303_s10  ;;  %s1503_s21 = sshll.u32 %s294_s7, 1  ;;  %v349_v1 = vld [vmem:[%s300_s13] sm:$0xf] (!%p1508_p3)  ;;  %v1740_v9 = vshrl.u32 (!%p1508_p3), %v404_v6, 7 }
  0x2c   : > { %s1502_s20 = sshll.u32 %s308_s19, 1  ;;  %347 = sbr.rel (%p1508_p3) target bundleno = 491 (0x1eb), region = 40  ;;  %v352_v3 = vmul.f32 (!%p1508_p3), 0.13333334, %v349_v1 }
  0x2d   : > { %p312_p2 = scmp.lt.s32.totalorder %s1502_s20, 1  ;;  %s1512_s30 = sshll.u32 (!%p1508_p3), %s1720_s6, 8  ;;  %v1743_v13 = vadd.s32 (!%p1508_p3), 8, %v1740_v9  ;;  %v1746_v14 = vsub.s32 (!%p1508_p3), 1, %v1740_v9  ;;  %v1749_v15 = vsub.s32 (!%p1508_p3), 3, %v1740_v9  ;;  %v1752_v16 = vsub.s32 (!%p1508_p3), 0, %v1740_v9 }
  0x2e   : > { %v353_v4 = vadd.f32 (!%p1508_p3), %v352_v3, %v350_v2  ;;  %v402_v11 = vstv (!%p1508_p3), %s1512_s30  ;;  %v1755_v17 = vsub.s32 (!%p1508_p3), 2, %v1740_v9  ;;  %v1758_v18 = vadd.s32 (!%p1508_p3), 16, %v1740_v9 }
  0x2f   : > { %s2644_s20 = smov (!%p312_p2, %s1502_s20), 1  ;;  %v1761_v19 = vadd.s32 (!%p1508_p3), 24, %v1740_v9  ;;  %v1764_v22 = vadd.s32 (!%p1508_p3), 32, %v1740_v9  ;;  %v1767_v23 = vadd.s32 (!%p1508_p3), 40, %v1740_v9  ;;  %v1770_v24 = vadd.s32 (!%p1508_p3), 48, %v1740_v9 }
  0x30   : > { %s315_s22 = sadd.s32 %s1503_s21, %s2644_s20  ;;  %v354_v5 = vadd.f32 (!%p1508_p3), 1.0, %v353_v4  ;;  %v1773_v25 = vadd.s32 (!%p1508_p3), 56, %v1740_v9  ;;  %v1776_v26 = vadd.s32 (!%p1508_p3), 64, %v1740_v9  ;;  %v1779_v27 = vadd.s32 (!%p1508_p3), 72, %v1740_v9 }
  0x31   : > { %s1504_s23 = sshll.u32 %s315_s22, 2  ;;  %v1782_v31 = vadd.s32 (!%p1508_p3), 80, %v1740_v9  ;;  %v1785_v32 = vadd.s32 (!%p1508_p3), 88, %v1740_v9  ;;  %v1788_v33 = vadd.s32 (!%p1508_p3), 96, %v1740_v9  ;;  %v1791_v34 = vadd.s32 (!%p1508_p3), 104, %v1740_v9 }
  0x32   : > { %s1734_s26 = scalar_lea.vmem %s2630_s4, %s1504_s23  ;;  %v355_v7 = vmul.f32 (!%p1508_p3), 16.0, %v354_v5  ;;  %v1794_v35 = vadd.s32 (!%p1508_p3), 112, %v1740_v9  ;;  %v1801_v42 = vadd.s32 (!%p1508_p3), 120, %v1740_v9  ;;  %v1810_v49 = vadd.s32 (!%p1508_p3), 128, %v1740_v9 }
  0x33   : > { %v1813_v50 = vadd.s32 136, %v1740_v9  ;;  %v1818_v54 = vadd.s32 144, %v1740_v9  ;;  %v1823_v59 = vadd.s32 152, %v1740_v9  ;;  %v1826_v60 = vadd.s32 160, %v1740_v9 }
  0x34   : > { %v1509_v8 = vadd.f32 -1.0, %v355_v7  ;;  %v1829_v61 = vadd.s32 168, %v1740_v9 }
  0x36   : > { %v357_v10 = vmul.f32 0.5, %v1509_v8 }
  0x38   : > { %v358_v12 = vfloor.f32 %v357_v10 }
  0x3a   : > { %v359_v20 = vsub.f32 %v357_v10, %v358_v12  ;;  %v1581_v21 = vtrunc.f32 %v358_v12 }
  0x3c   : > { %v360_v28 = vsub.f32 1.0, %v359_v20  ;;  %v1582_v29 = vcvt.f32.s32 %v1581_v21  ;;  %v389_v30 = vrot.slane %v359_v20, 7 }
  0x3e   : > { %vm362_vm0 = vcmp.ge.s32.totalorder %v1582_v29, 0  ;;  %vm363_vm1 = vcmp.le.s32.totalorder %v1582_v29, 15  ;;  %v365_v36 = vadd.s32 1, %v1582_v29  ;;  %v375_v37 = vrot.slane %v360_v28, 7 }
  0x3f   : > { %vm1796_vm2 = vmand %vm362_vm0, %vm363_vm1  ;;  %v390_v39 = vrot.slane %v389_v30, 2  ;;  %v399_v40 = vmul.u32 16, %v1582_v29  ;;  %v400_v41 = vrot.slane %v1582_v29, 7 }
  0x40   : > { %vm366_vm3 = vcmp.ge.s32.totalorder %v365_v36, 0  ;;  %vm367_vm4 = vcmp.le.s32.totalorder %v365_v36, 15  ;;  %v369_v44 = vsel %vm1796_vm2, 1, %v1665_v43  ;;  %v376_v45 = vrot.slane %v375_v37, 2 }
  0x41   : > { %vm1805_vm5 = vmand %vm366_vm3, %vm367_vm4  ;;  %v1510_v47 = vrot.slane %v369_v44, 9  ;;  %v401_v48 = vadd.s32 %v400_v41, %v399_v40  ;;  %v392_v56 = vmul.f32 %v390_v39, %v360_v28  ;;  %v395_v58 = vmul.f32 %v390_v39, %v359_v20 }
  0x42   : > { %v378_v51 = vmul.f32 %v376_v45, %v360_v28  ;;  %v381_v52 = vmul.f32 %v376_v45, %v359_v20  ;;  %v383_v53 = vsel %vm1805_vm5, 1, %v1665_v43 }
  0x43   : > { %vm372_vm6 = vcmp.ne.s32.totalorder %v1510_v47, 0  ;;  %v1511_v55 = vrot.slane %v383_v53, 9  ;;  %v403_v57 = vsub.s32 %v401_v48, %v402_v11 }
  0x44   : > { %vm373_vm7 = vmand %vm1796_vm2, %vm372_vm6 }
  0x45   : > { %v379_v62 = vsel %vm373_vm7, %v378_v51, 0.0  ;;  %vm380_vm8 = vmand %vm1805_vm5, %vm372_vm6  ;;  %vm386_vm9 = vcmp.ne.s32.totalorder %v1511_v55, 0  ;;  %v444_v63 = vrot.slane %v403_v57, %v1749_v15  ;;  %v600_v0 = vadd.s32 1, %v403_v57 }
  0x46   : > { %v382_v1 = vsel %vm380_vm8, %v381_v52, 0.0  ;;  %vm387_vm10 = vmand %vm1796_vm2, %vm386_vm9  ;;  %v525_v2 = vrot.slane %v379_v62, %v1755_v17  ;;  %v1837_v3 = vadd.s32 16, %v403_v57  ;;  %v1839_v4 = vadd.s32 17, %v403_v57 }
  0x47   : > { %v1841_v5 = vsel %vm387_vm10, %v392_v56, 0.0  ;;  %vm394_vm11 = vmand %vm1805_vm5, %vm386_vm9  ;;  %v1846_v6 = vrot.slane %v444_v63, %v1746_v14  ;;  %v608_v7 = vrot.slane %v600_v0, %v1749_v15  ;;  %v689_v8 = vrot.slane %v382_v1, %v1755_v17 }
  0x48   : > { %v1850_v10 = vsel %vm394_vm11, %v395_v58, 0.0  ;;  %v1853_v11 = vrot.slane %v525_v2, %v1752_v16  ;;  %v836_v12 = vrot.slane %v1837_v3, %v1749_v15  ;;  %v917_v20 = vrot.slane %v1841_v5, %v1755_v17 }
  0x49   : > { %vm454_vm12 = vcmp.eq.s32.totalorder %v1740_v9, %v1846_v6  ;;  %vm456_vm13 = vcmp.eq.s32.totalorder %v1743_v13, %v1846_v6  ;;  %v1864_v21 = vrot.slane %v608_v7, %v1746_v14  ;;  %v1867_v28 = vrot.slane %v689_v8, %v1752_v16 }
  0x4a   : > { %v537_v29 = vsel %vm454_vm12, %v1853_v11, 0.0  ;;  %v539_v30 = vsel %vm456_vm13, %v1853_v11, 0.0  ;;  %v1872_v36 = vrot.slane %v836_v12, %v1746_v14  ;;  %v1875_v37 = vrot.slane %v917_v20, %v1752_v16 }
  0x4b   : > { %vm618_vm14 = vcmp.eq.s32.totalorder %v1740_v9, %v1864_v21  ;;  %vm620_vm15 = vcmp.eq.s32.totalorder %v1743_v13, %v1864_v21  ;;  %v1064_v38 = vrot.slane %v1839_v4, %v1749_v15  ;;  %v1145_v39 = vrot.slane %v1850_v10, %v1755_v17 }
  0x4c   : > { %v701_v40 = vsel %vm618_vm14, %v1867_v28, 0.0  ;;  %v703_v41 = vsel %vm620_vm15, %v1867_v28, 0.0  ;;  %vm846_vm0 = vcmp.eq.s32.totalorder %v1740_v9, %v1872_v36  ;;  %vm848_vm1 = vcmp.eq.s32.totalorder %v1743_v13, %v1872_v36 }
  0x4d   : > { %v765_v43 = vadd.f32 %v701_v40, %v537_v29  ;;  %v767_v44 = vadd.f32 %v703_v41, %v539_v30  ;;  %v929_v45 = vsel %vm846_vm0, %v1875_v37, 0.0  ;;  %v931_v46 = vsel %vm848_vm1, %v1875_v37, 0.0 }
  0x4e   : > { %v1894_v15 = vrot.slane %v1064_v38, %v1746_v14  ;;  %v1897_v17 = vrot.slane %v1145_v39, %v1752_v16  ;;  %v440_v47 = vrot.slane %v403_v57, %v1746_v14  ;;  %v521_v48 = vrot.slane %v379_v62, %v1752_v16 }
  0x4f   : > { %v993_v51 = vadd.f32 %v929_v45, %v765_v43  ;;  %v995_v52 = vadd.f32 %v931_v46, %v767_v44  ;;  %v604_v53 = vrot.slane %v600_v0, %v1746_v14  ;;  %v685_v55 = vrot.slane %v382_v1, %v1752_v16 }
  0x50   : > { %vm1074_vm2 = vcmp.eq.s32.totalorder %v1740_v9, %v1894_v15  ;;  %vm1076_vm3 = vcmp.eq.s32.totalorder %v1743_v13, %v1894_v15  ;;  %v1908_v56 = vrot.slane %v440_v47, %v1746_v14  ;;  %v1911_v58 = vrot.slane %v521_v48, %v1752_v16 }
  0x51   : > { %v1157_v57 = vsel %vm1074_vm2, %v1897_v17, 0.0  ;;  %v1159_v62 = vsel %vm1076_vm3, %v1897_v17, 0.0  ;;  %v1916_v63 = vrot.slane %v604_v53, %v1746_v14  ;;  %v1919_v0 = vrot.slane %v685_v55, %v1752_v16 }
  0x52   : > { %v1221_v1 = vadd.f32 %v1157_v57, %v993_v51  ;;  %v1223_v2 = vadd.f32 %v1159_v62, %v995_v52  ;;  %vm453_vm4 = vcmp.eq.s32.totalorder %v1740_v9, %v1908_v56  ;;  %vm455_vm5 = vcmp.eq.s32.totalorder %v1743_v13, %v1908_v56 }
  0x53   : > { %v536_v7 = vsel %vm453_vm4, %v1911_v58, 0.0  ;;  %v538_v8 = vsel %vm455_vm5, %v1911_v58, 0.0  ;;  %vm617_vm6 = vcmp.eq.s32.totalorder %v1740_v9, %v1916_v63  ;;  %vm619_vm7 = vcmp.eq.s32.totalorder %v1743_v13, %v1916_v63 }
  0x54   : > { %v1517_v12 = vpack.c.bf16 %v1223_v2, %v1221_v1  ;;  %v700_v20 = vsel %vm617_vm6, %v1919_v0, 0.0  ;;  %v702_v29 = vsel %vm619_vm7, %v1919_v0, 0.0  ;;  %v832_v30 = vrot.slane %v1837_v3, %v1746_v14 }
  0x55   : > { %v764_v38 = vadd.f32 %v700_v20, %v536_v7  ;;  %v766_v39 = vadd.f32 %v702_v29, %v538_v8  ;;  %v913_v40 = vrot.slane %v1841_v5, %v1752_v16  ;;  %v1060_v41 = vrot.slane %v1839_v4, %v1746_v14 }
  0x56   : > { %1518 = vmatprep.subr.bf16.mxu0 %v1517_v12  ;;  %v1940_v43 = vrot.slane %v832_v30, %v1746_v14  ;;  %v1141_v44 = vrot.slane %v1850_v10, %v1752_v16  ;;  %vm458_vm8 = vcmp.eq.s32.totalorder %v1758_v18, %v1846_v6  ;;  %vm460_vm9 = vcmp.eq.s32.totalorder %v1761_v19, %v1846_v6 }
  0x57   : > { %v1949_v3 = vrot.slane %v913_v40, %v1752_v16  ;;  %v1952_v5 = vrot.slane %v1060_v41, %v1746_v14  ;;  %v541_v4 = vsel %vm458_vm8, %v1853_v11, 0.0  ;;  %v543_v45 = vsel %vm460_vm9, %v1853_v11, 0.0 }
  0x58   : > { %vm845_vm10 = vcmp.eq.s32.totalorder %v1740_v9, %v1940_v43  ;;  %vm847_vm11 = vcmp.eq.s32.totalorder %v1743_v13, %v1940_v43  ;;  %v1961_v10 = vrot.slane %v1141_v44, %v1752_v16  ;;  %vm622_vm12 = vcmp.eq.s32.totalorder %v1758_v18, %v1864_v21 }
  0x59   : > { %v928_v46 = vsel %vm845_vm10, %v1949_v3, 0.0  ;;  %v930_v14 = vsel %vm847_vm11, %v1949_v3, 0.0  ;;  %vm1073_vm13 = vcmp.eq.s32.totalorder %v1740_v9, %v1952_v5  ;;  %vm1075_vm14 = vcmp.eq.s32.totalorder %v1743_v13, %v1952_v5 }
  0x5a   : > { %v992_v47 = vadd.f32 %v928_v46, %v764_v38  ;;  %v994_v48 = vadd.f32 %v930_v14, %v766_v39  ;;  %v1156_v51 = vsel %vm1073_vm13, %v1961_v10, 0.0  ;;  %v1158_v16 = vsel %vm1075_vm14, %v1961_v10, 0.0 }
  0x5b   : > { %vm624_vm15 = vcmp.eq.s32.totalorder %v1761_v19, %v1864_v21  ;;  %v705_v52 = vsel %vm622_vm12, %v1867_v28, 0.0  ;;  %vm850_vm0 = vcmp.eq.s32.totalorder %v1758_v18, %v1872_v36  ;;  %vm852_vm1 = vcmp.eq.s32.totalorder %v1761_v19, %v1872_v36 }
  0x5c   : > { %v1220_v53 = vadd.f32 %v1156_v51, %v992_v47  ;;  %v1222_v55 = vadd.f32 %v1158_v16, %v994_v48  ;;  %v707_v13 = vsel %vm624_vm15, %v1867_v28, 0.0  ;;  %v769_v57 = vadd.f32 %v705_v52, %v541_v4 }
  0x5d   : > { %v771_v62 = vadd.f32 %v707_v13, %v543_v45  ;;  %v933_v1 = vsel %vm850_vm0, %v1875_v37, 0.0  ;;  %v935_v2 = vsel %vm852_vm1, %v1875_v37, 0.0  ;;  %vm1078_vm2 = vcmp.eq.s32.totalorder %v1758_v18, %v1894_v15 }
  0x5e   : > { %v1519_v7 = vpack.c.bf16 %v1222_v55, %v1220_v53  ;;  %v997_v8 = vadd.f32 %v933_v1, %v769_v57  ;;  %vm1080_vm3 = vcmp.eq.s32.totalorder %v1761_v19, %v1894_v15  ;;  %v1161_v12 = vsel %vm1078_vm2, %v1897_v17, 0.0 }
  0x5f   : > { %v999_v20 = vadd.f32 %v935_v2, %v771_v62  ;;  %v1163_v29 = vsel %vm1080_vm3, %v1897_v17, 0.0  ;;  %vm457_vm4 = vcmp.eq.s32.totalorder %v1758_v18, %v1908_v56  ;;  %vm459_vm5 = vcmp.eq.s32.totalorder %v1761_v19, %v1908_v56 }
  0x60   : > { %1520 = vmatpush1.bf16.msra.mxu0 %v1519_v7  ;;  %v1225_v30 = vadd.f32 %v1161_v12, %v997_v8  ;;  %v540_v38 = vsel %vm457_vm4, %v1911_v58, 0.0  ;;  %v542_v39 = vsel %vm459_vm5, %v1911_v58, 0.0  ;;  %vm621_vm6 = vcmp.eq.s32.totalorder %v1758_v18, %v1916_v63 }
  0x61   : > { %v1227_v40 = vadd.f32 %v1163_v29, %v999_v20  ;;  %vm623_vm7 = vcmp.eq.s32.totalorder %v1761_v19, %v1916_v63  ;;  %v704_v41 = vsel %vm621_vm6, %v1919_v0, 0.0  ;;  %vm849_vm8 = vcmp.eq.s32.totalorder %v1758_v18, %v1940_v43 }
  0x62   : > { %v706_v44 = vsel %vm623_vm7, %v1919_v0, 0.0  ;;  %v768_v4 = vadd.f32 %v704_v41, %v540_v38  ;;  %vm851_vm9 = vcmp.eq.s32.totalorder %v1761_v19, %v1940_v43  ;;  %v932_v45 = vsel %vm849_vm8, %v1949_v3, 0.0 }
  0x63   : > { %v1521_v46 = vpack.c.bf16 %v1227_v40, %v1225_v30  ;;  %v770_v14 = vadd.f32 %v706_v44, %v542_v39  ;;  %v934_v47 = vsel %vm851_vm9, %v1949_v3, 0.0  ;;  %vm1077_vm10 = vcmp.eq.s32.totalorder %v1758_v18, %v1952_v5 }
  0x64   : > { %v996_v48 = vadd.f32 %v932_v45, %v768_v4  ;;  %vm1079_vm11 = vcmp.eq.s32.totalorder %v1761_v19, %v1952_v5  ;;  %v1160_v51 = vsel %vm1077_vm10, %v1961_v10, 0.0  ;;  %vm462_vm12 = vcmp.eq.s32.totalorder %v1764_v22, %v1846_v6 }
  0x65   : > { %1522 = vmatprep.subr.bf16.mxu0 %v1521_v46  ;;  %v998_v16 = vadd.f32 %v934_v47, %v770_v14  ;;  %v1162_v52 = vsel %vm1079_vm11, %v1961_v10, 0.0  ;;  %vm464_vm13 = vcmp.eq.s32.totalorder %v1767_v23, %v1846_v6  ;;  %v545_v53 = vsel %vm462_vm12, %v1853_v11, 0.0 }
  0x66   : > { %v1224_v55 = vadd.f32 %v1160_v51, %v996_v48  ;;  %v547_v18 = vsel %vm464_vm13, %v1853_v11, 0.0  ;;  %vm626_vm14 = vcmp.eq.s32.totalorder %v1764_v22, %v1864_v21  ;;  %vm628_vm15 = vcmp.eq.s32.totalorder %v1767_v23, %v1864_v21 }
  0x67   : > { %v1226_v19 = vadd.f32 %v1162_v52, %v998_v16  ;;  %v709_v13 = vsel %vm626_vm14, %v1867_v28, 0.0  ;;  %v711_v57 = vsel %vm628_vm15, %v1867_v28, 0.0  ;;  %vm854_vm0 = vcmp.eq.s32.totalorder %v1764_v22, %v1872_v36 }
  0x68   : > { %v773_v62 = vadd.f32 %v709_v13, %v545_v53  ;;  %v775_v1 = vadd.f32 %v711_v57, %v547_v18  ;;  %vm856_vm1 = vcmp.eq.s32.totalorder %v1767_v23, %v1872_v36  ;;  %v937_v2 = vsel %vm854_vm0, %v1875_v37, 0.0 }
  0x69   : > { %v1523_v7 = vpack.c.bf16 %v1226_v19, %v1224_v55  ;;  %v939_v8 = vsel %vm856_vm1, %v1875_v37, 0.0  ;;  %vm1082_vm2 = vcmp.eq.s32.totalorder %v1764_v22, %v1894_v15  ;;  %vm1084_vm3 = vcmp.eq.s32.totalorder %v1767_v23, %v1894_v15 }
  0x6a   : > { %v1001_v12 = vadd.f32 %v937_v2, %v773_v62  ;;  %v1003_v20 = vadd.f32 %v939_v8, %v775_v1  ;;  %v1165_v29 = vsel %vm1082_vm2, %v1897_v17, 0.0  ;;  %v1167_v30 = vsel %vm1084_vm3, %v1897_v17, 0.0 }
  0x6b   : > { %1524 = vmatpush1.bf16.msra.mxu0 %v1523_v7  ;;  %vm461_vm4 = vcmp.eq.s32.totalorder %v1764_v22, %v1908_v56  ;;  %vm463_vm5 = vcmp.eq.s32.totalorder %v1767_v23, %v1908_v56  ;;  %vm625_vm6 = vcmp.eq.s32.totalorder %v1764_v22, %v1916_v63  ;;  %vm627_vm7 = vcmp.eq.s32.totalorder %v1767_v23, %v1916_v63 }
  0x6c   : > { %v1229_v38 = vadd.f32 %v1165_v29, %v1001_v12  ;;  %v1231_v39 = vadd.f32 %v1167_v30, %v1003_v20  ;;  %v544_v40 = vsel %vm461_vm4, %v1911_v58, 0.0  ;;  %v546_v41 = vsel %vm463_vm5, %v1911_v58, 0.0 }
  0x6d   : > { %v708_v44 = vsel %vm625_vm6, %v1919_v0, 0.0  ;;  %v710_v4 = vsel %vm627_vm7, %v1919_v0, 0.0  ;;  %vm853_vm8 = vcmp.eq.s32.totalorder %v1764_v22, %v1940_v43  ;;  %vm855_vm9 = vcmp.eq.s32.totalorder %v1767_v23, %v1940_v43 }
  0x6e   : > { %v1525_v45 = vpack.c.bf16 %v1231_v39, %v1229_v38  ;;  %v772_v46 = vadd.f32 %v708_v44, %v544_v40  ;;  %v774_v14 = vadd.f32 %v710_v4, %v546_v41  ;;  %v936_v47 = vsel %vm853_vm8, %v1949_v3, 0.0 }
  0x6f   : > { %v938_v48 = vsel %vm855_vm9, %v1949_v3, 0.0  ;;  %vm1081_vm10 = vcmp.eq.s32.totalorder %v1764_v22, %v1952_v5  ;;  %vm1083_vm11 = vcmp.eq.s32.totalorder %v1767_v23, %v1952_v5  ;;  %vm466_vm12 = vcmp.eq.s32.totalorder %v1770_v24, %v1846_v6 }
  0x70   : > { %1526 = vmatprep.subr.bf16.mxu0 %v1525_v45  ;;  %v1000_v51 = vadd.f32 %v936_v47, %v772_v46  ;;  %v1002_v16 = vadd.f32 %v938_v48, %v774_v14  ;;  %v1164_v52 = vsel %vm1081_vm10, %v1961_v10, 0.0  ;;  %v1166_v53 = vsel %vm1083_vm11, %v1961_v10, 0.0 }
  0x71   : > { %vm468_vm13 = vcmp.eq.s32.totalorder %v1773_v25, %v1846_v6  ;;  %v549_v55 = vsel %vm466_vm12, %v1853_v11, 0.0  ;;  %vm630_vm14 = vcmp.eq.s32.totalorder %v1770_v24, %v1864_v21  ;;  %vm632_vm15 = vcmp.eq.s32.totalorder %v1773_v25, %v1864_v21 }
  0x72   : > { %v1228_v22 = vadd.f32 %v1164_v52, %v1000_v51  ;;  %v1230_v23 = vadd.f32 %v1166_v53, %v1002_v16  ;;  %v551_v18 = vsel %vm468_vm13, %v1853_v11, 0.0  ;;  %v713_v19 = vsel %vm630_vm14, %v1867_v28, 0.0 }
  0x73   : > { %v715_v13 = vsel %vm632_vm15, %v1867_v28, 0.0  ;;  %v777_v57 = vadd.f32 %v713_v19, %v549_v55  ;;  %vm858_vm0 = vcmp.eq.s32.totalorder %v1770_v24, %v1872_v36  ;;  %vm860_vm1 = vcmp.eq.s32.totalorder %v1773_v25, %v1872_v36 }
  0x74   : > { %v1527_v62 = vpack.c.bf16 %v1230_v23, %v1228_v22  ;;  %v779_v1 = vadd.f32 %v715_v13, %v551_v18  ;;  %v941_v2 = vsel %vm858_vm0, %v1875_v37, 0.0  ;;  %v943_v7 = vsel %vm860_vm1, %v1875_v37, 0.0 }
  0x75   : > { %v1005_v8 = vadd.f32 %v941_v2, %v777_v57  ;;  %vm1086_vm2 = vcmp.eq.s32.totalorder %v1770_v24, %v1894_v15  ;;  %vm1088_vm3 = vcmp.eq.s32.totalorder %v1773_v25, %v1894_v15  ;;  %vm465_vm4 = vcmp.eq.s32.totalorder %v1770_v24, %v1908_v56 }
  0x76   : > { %1528 = vmatpush1.bf16.msra.mxu0 %v1527_v62  ;;  %v1007_v12 = vadd.f32 %v943_v7, %v779_v1  ;;  %v1169_v20 = vsel %vm1086_vm2, %v1897_v17, 0.0  ;;  %v1171_v29 = vsel %vm1088_vm3, %v1897_v17, 0.0  ;;  %vm467_vm5 = vcmp.eq.s32.totalorder %v1773_v25, %v1908_v56 }
  0x77   : > { %v1233_v30 = vadd.f32 %v1169_v20, %v1005_v8  ;;  %v548_v38 = vsel %vm465_vm4, %v1911_v58, 0.0  ;;  %v550_v39 = vsel %vm467_vm5, %v1911_v58, 0.0  ;;  %vm629_vm6 = vcmp.eq.s32.totalorder %v1770_v24, %v1916_v63 }
  0x78   : > { %v1235_v40 = vadd.f32 %v1171_v29, %v1007_v12  ;;  %vm631_vm7 = vcmp.eq.s32.totalorder %v1773_v25, %v1916_v63  ;;  %v712_v41 = vsel %vm629_vm6, %v1919_v0, 0.0  ;;  %vm857_vm8 = vcmp.eq.s32.totalorder %v1770_v24, %v1940_v43 }
  0x79   : > { %v714_v44 = vsel %vm631_vm7, %v1919_v0, 0.0  ;;  %v776_v4 = vadd.f32 %v712_v41, %v548_v38  ;;  %vm859_vm9 = vcmp.eq.s32.totalorder %v1773_v25, %v1940_v43  ;;  %v940_v45 = vsel %vm857_vm8, %v1949_v3, 0.0 }
  0x7a   : > { %v1529_v46 = vpack.c.bf16 %v1235_v40, %v1233_v30  ;;  %v778_v14 = vadd.f32 %v714_v44, %v550_v39  ;;  %v942_v47 = vsel %vm859_vm9, %v1949_v3, 0.0  ;;  %vm1085_vm10 = vcmp.eq.s32.totalorder %v1770_v24, %v1952_v5 }
  0x7b   : > { %v1004_v48 = vadd.f32 %v940_v45, %v776_v4  ;;  %vm1087_vm11 = vcmp.eq.s32.totalorder %v1773_v25, %v1952_v5  ;;  %v1168_v51 = vsel %vm1085_vm10, %v1961_v10, 0.0  ;;  %vm470_vm12 = vcmp.eq.s32.totalorder %v1776_v26, %v1846_v6 }
  0x7c   : > { %1530 = vmatprep.subr.bf16.mxu0 %v1529_v46  ;;  %v1006_v16 = vadd.f32 %v942_v47, %v778_v14  ;;  %v1170_v52 = vsel %vm1087_vm11, %v1961_v10, 0.0  ;;  %vm472_vm13 = vcmp.eq.s32.totalorder %v1779_v27, %v1846_v6  ;;  %v553_v53 = vsel %vm470_vm12, %v1853_v11, 0.0 }
  0x7d   : > { %v1232_v55 = vadd.f32 %v1168_v51, %v1004_v48  ;;  %v555_v24 = vsel %vm472_vm13, %v1853_v11, 0.0  ;;  %vm634_vm14 = vcmp.eq.s32.totalorder %v1776_v26, %v1864_v21  ;;  %vm636_vm15 = vcmp.eq.s32.totalorder %v1779_v27, %v1864_v21 }
  0x7e   : > { %v1234_v25 = vadd.f32 %v1170_v52, %v1006_v16  ;;  %v717_v22 = vsel %vm634_vm14, %v1867_v28, 0.0  ;;  %v719_v23 = vsel %vm636_vm15, %v1867_v28, 0.0  ;;  %vm862_vm0 = vcmp.eq.s32.totalorder %v1776_v26, %v1872_v36 }
  0x7f   : > { %v781_v18 = vadd.f32 %v717_v22, %v553_v53  ;;  %v783_v19 = vadd.f32 %v719_v23, %v555_v24  ;;  %vm864_vm1 = vcmp.eq.s32.totalorder %v1779_v27, %v1872_v36  ;;  %v945_v13 = vsel %vm862_vm0, %v1875_v37, 0.0 }
  0x80   : > { %v1531_v57 = vpack.c.bf16 %v1234_v25, %v1232_v55  ;;  %v947_v62 = vsel %vm864_vm1, %v1875_v37, 0.0  ;;  %vm1090_vm2 = vcmp.eq.s32.totalorder %v1776_v26, %v1894_v15  ;;  %vm1092_vm3 = vcmp.eq.s32.totalorder %v1779_v27, %v1894_v15 }
  0x81   : > { %v1009_v1 = vadd.f32 %v945_v13, %v781_v18  ;;  %v1011_v2 = vadd.f32 %v947_v62, %v783_v19  ;;  %v1173_v7 = vsel %vm1090_vm2, %v1897_v17, 0.0  ;;  %v1175_v8 = vsel %vm1092_vm3, %v1897_v17, 0.0 }
  0x82   : > { %1532 = vmatpush1.bf16.msra.mxu0 %v1531_v57  ;;  %vm469_vm4 = vcmp.eq.s32.totalorder %v1776_v26, %v1908_v56  ;;  %vm471_vm5 = vcmp.eq.s32.totalorder %v1779_v27, %v1908_v56  ;;  %vm633_vm6 = vcmp.eq.s32.totalorder %v1776_v26, %v1916_v63  ;;  %vm635_vm7 = vcmp.eq.s32.totalorder %v1779_v27, %v1916_v63 }
  0x83   : > { %v1237_v12 = vadd.f32 %v1173_v7, %v1009_v1  ;;  %v1239_v20 = vadd.f32 %v1175_v8, %v1011_v2  ;;  %v552_v29 = vsel %vm469_vm4, %v1911_v58, 0.0  ;;  %v554_v30 = vsel %vm471_vm5, %v1911_v58, 0.0 }
  0x84   : > { %v716_v38 = vsel %vm633_vm6, %v1919_v0, 0.0  ;;  %v718_v39 = vsel %vm635_vm7, %v1919_v0, 0.0  ;;  %vm861_vm8 = vcmp.eq.s32.totalorder %v1776_v26, %v1940_v43  ;;  %vm863_vm9 = vcmp.eq.s32.totalorder %v1779_v27, %v1940_v43 }
  0x85   : > { %v1533_v40 = vpack.c.bf16 %v1239_v20, %v1237_v12  ;;  %v780_v41 = vadd.f32 %v716_v38, %v552_v29  ;;  %v782_v44 = vadd.f32 %v718_v39, %v554_v30  ;;  %v944_v4 = vsel %vm861_vm8, %v1949_v3, 0.0 }
  0x86   : > { %v946_v45 = vsel %vm863_vm9, %v1949_v3, 0.0  ;;  %vm1089_vm10 = vcmp.eq.s32.totalorder %v1776_v26, %v1952_v5  ;;  %vm1091_vm11 = vcmp.eq.s32.totalorder %v1779_v27, %v1952_v5  ;;  %vm474_vm12 = vcmp.eq.s32.totalorder %v1782_v31, %v1846_v6 }
  0x87   : > { %1534 = vmatprep.subr.bf16.mxu0 %v1533_v40  ;;  %v1008_v46 = vadd.f32 %v944_v4, %v780_v41  ;;  %v1010_v14 = vadd.f32 %v946_v45, %v782_v44  ;;  %v1172_v47 = vsel %vm1089_vm10, %v1961_v10, 0.0  ;;  %v1174_v48 = vsel %vm1091_vm11, %v1961_v10, 0.0 }
  0x88   : > { %vm476_vm13 = vcmp.eq.s32.totalorder %v1785_v32, %v1846_v6  ;;  %v557_v51 = vsel %vm474_vm12, %v1853_v11, 0.0  ;;  %vm638_vm14 = vcmp.eq.s32.totalorder %v1782_v31, %v1864_v21  ;;  %vm640_vm15 = vcmp.eq.s32.totalorder %v1785_v32, %v1864_v21 }
  0x89   : > { %v1236_v26 = vadd.f32 %v1172_v47, %v1008_v46  ;;  %v1238_v27 = vadd.f32 %v1174_v48, %v1010_v14  ;;  %v559_v16 = vsel %vm476_vm13, %v1853_v11, 0.0  ;;  %v721_v52 = vsel %vm638_vm14, %v1867_v28, 0.0 }
  0x8a   : > { %v723_v53 = vsel %vm640_vm15, %v1867_v28, 0.0  ;;  %v785_v55 = vadd.f32 %v721_v52, %v557_v51  ;;  %vm866_vm0 = vcmp.eq.s32.totalorder %v1782_v31, %v1872_v36  ;;  %vm868_vm1 = vcmp.eq.s32.totalorder %v1785_v32, %v1872_v36 }
  0x8b   : > { %v1535_v24 = vpack.c.bf16 %v1238_v27, %v1236_v26  ;;  %v787_v25 = vadd.f32 %v723_v53, %v559_v16  ;;  %v949_v22 = vsel %vm866_vm0, %v1875_v37, 0.0  ;;  %v951_v23 = vsel %vm868_vm1, %v1875_v37, 0.0 }
  0x8c   : > { %v1013_v18 = vadd.f32 %v949_v22, %v785_v55  ;;  %vm1094_vm2 = vcmp.eq.s32.totalorder %v1782_v31, %v1894_v15  ;;  %vm1096_vm3 = vcmp.eq.s32.totalorder %v1785_v32, %v1894_v15  ;;  %vm473_vm4 = vcmp.eq.s32.totalorder %v1782_v31, %v1908_v56 }
  0x8d   : > { %1536 = vmatpush1.bf16.msra.mxu0 %v1535_v24  ;;  %v1015_v19 = vadd.f32 %v951_v23, %v787_v25  ;;  %v1177_v13 = vsel %vm1094_vm2, %v1897_v17, 0.0  ;;  %v1179_v57 = vsel %vm1096_vm3, %v1897_v17, 0.0  ;;  %vm475_vm5 = vcmp.eq.s32.totalorder %v1785_v32, %v1908_v56 }
  0x8e   : > { %v1241_v62 = vadd.f32 %v1177_v13, %v1013_v18  ;;  %v556_v1 = vsel %vm473_vm4, %v1911_v58, 0.0  ;;  %v558_v2 = vsel %vm475_vm5, %v1911_v58, 0.0  ;;  %vm637_vm6 = vcmp.eq.s32.totalorder %v1782_v31, %v1916_v63 }
  0x8f   : > { %v1243_v7 = vadd.f32 %v1179_v57, %v1015_v19  ;;  %vm639_vm7 = vcmp.eq.s32.totalorder %v1785_v32, %v1916_v63  ;;  %v720_v8 = vsel %vm637_vm6, %v1919_v0, 0.0  ;;  %vm865_vm8 = vcmp.eq.s32.totalorder %v1782_v31, %v1940_v43 }
  0x90   : > { %v722_v12 = vsel %vm639_vm7, %v1919_v0, 0.0  ;;  %v784_v20 = vadd.f32 %v720_v8, %v556_v1  ;;  %vm867_vm9 = vcmp.eq.s32.totalorder %v1785_v32, %v1940_v43  ;;  %v948_v29 = vsel %vm865_vm8, %v1949_v3, 0.0 }
  0x91   : > { %v1537_v30 = vpack.c.bf16 %v1243_v7, %v1241_v62  ;;  %v786_v38 = vadd.f32 %v722_v12, %v558_v2  ;;  %v950_v39 = vsel %vm867_vm9, %v1949_v3, 0.0  ;;  %vm1093_vm10 = vcmp.eq.s32.totalorder %v1782_v31, %v1952_v5 }
  0x92   : > { %v1012_v40 = vadd.f32 %v948_v29, %v784_v20  ;;  %vm1095_vm11 = vcmp.eq.s32.totalorder %v1785_v32, %v1952_v5  ;;  %v1176_v41 = vsel %vm1093_vm10, %v1961_v10, 0.0  ;;  %vm478_vm12 = vcmp.eq.s32.totalorder %v1788_v33, %v1846_v6 }
  0x93   : > { %1538 = vmatprep.subr.bf16.mxu0 %v1537_v30  ;;  %v1014_v44 = vadd.f32 %v950_v39, %v786_v38  ;;  %v1178_v4 = vsel %vm1095_vm11, %v1961_v10, 0.0  ;;  %vm480_vm13 = vcmp.eq.s32.totalorder %v1791_v34, %v1846_v6  ;;  %v561_v45 = vsel %vm478_vm12, %v1853_v11, 0.0 }
  0x94   : > { %v1240_v46 = vadd.f32 %v1176_v41, %v1012_v40  ;;  %v563_v31 = vsel %vm480_vm13, %v1853_v11, 0.0  ;;  %vm642_vm14 = vcmp.eq.s32.totalorder %v1788_v33, %v1864_v21  ;;  %vm644_vm15 = vcmp.eq.s32.totalorder %v1791_v34, %v1864_v21 }
  0x95   : > { %v1242_v32 = vadd.f32 %v1178_v4, %v1014_v44  ;;  %v725_v14 = vsel %vm642_vm14, %v1867_v28, 0.0  ;;  %v727_v47 = vsel %vm644_vm15, %v1867_v28, 0.0  ;;  %vm870_vm0 = vcmp.eq.s32.totalorder %v1788_v33, %v1872_v36 }
  0x96   : > { %v789_v48 = vadd.f32 %v725_v14, %v561_v45  ;;  %v791_v51 = vadd.f32 %v727_v47, %v563_v31  ;;  %vm872_vm1 = vcmp.eq.s32.totalorder %v1791_v34, %v1872_v36  ;;  %v953_v26 = vsel %vm870_vm0, %v1875_v37, 0.0 }
  0x97   : > { %v1539_v27 = vpack.c.bf16 %v1242_v32, %v1240_v46  ;;  %v955_v16 = vsel %vm872_vm1, %v1875_v37, 0.0  ;;  %vm1098_vm2 = vcmp.eq.s32.totalorder %v1788_v33, %v1894_v15  ;;  %vm1100_vm3 = vcmp.eq.s32.totalorder %v1791_v34, %v1894_v15 }
  0x98   : > { %v1017_v52 = vadd.f32 %v953_v26, %v789_v48  ;;  %v1019_v53 = vadd.f32 %v955_v16, %v791_v51  ;;  %v1181_v55 = vsel %vm1098_vm2, %v1897_v17, 0.0  ;;  %v1183_v24 = vsel %vm1100_vm3, %v1897_v17, 0.0 }
  0x99   : > { %1540 = vmatpush1.bf16.msra.mxu0 %v1539_v27  ;;  %vm477_vm4 = vcmp.eq.s32.totalorder %v1788_v33, %v1908_v56  ;;  %vm479_vm5 = vcmp.eq.s32.totalorder %v1791_v34, %v1908_v56  ;;  %vm641_vm6 = vcmp.eq.s32.totalorder %v1788_v33, %v1916_v63  ;;  %vm643_vm7 = vcmp.eq.s32.totalorder %v1791_v34, %v1916_v63 }
  0x9a   : > { %v1245_v25 = vadd.f32 %v1181_v55, %v1017_v52  ;;  %v1247_v22 = vadd.f32 %v1183_v24, %v1019_v53  ;;  %v560_v23 = vsel %vm477_vm4, %v1911_v58, 0.0  ;;  %v562_v18 = vsel %vm479_vm5, %v1911_v58, 0.0 }
  0x9b   : > { %v724_v19 = vsel %vm641_vm6, %v1919_v0, 0.0  ;;  %v726_v13 = vsel %vm643_vm7, %v1919_v0, 0.0  ;;  %vm869_vm8 = vcmp.eq.s32.totalorder %v1788_v33, %v1940_v43  ;;  %vm871_vm9 = vcmp.eq.s32.totalorder %v1791_v34, %v1940_v43 }
  0x9c   : > { %v1541_v57 = vpack.c.bf16 %v1247_v22, %v1245_v25  ;;  %v788_v62 = vadd.f32 %v724_v19, %v560_v23  ;;  %v790_v1 = vadd.f32 %v726_v13, %v562_v18  ;;  %v952_v2 = vsel %vm869_vm8, %v1949_v3, 0.0 }
  0x9d   : > { %v954_v7 = vsel %vm871_vm9, %v1949_v3, 0.0  ;;  %vm1097_vm10 = vcmp.eq.s32.totalorder %v1788_v33, %v1952_v5  ;;  %vm1099_vm11 = vcmp.eq.s32.totalorder %v1791_v34, %v1952_v5  ;;  %vm482_vm12 = vcmp.eq.s32.totalorder %v1794_v35, %v1846_v6 }
  0x9e   : > { %1542 = vmatprep.subr.bf16.mxu0 %v1541_v57  ;;  %v1016_v8 = vadd.f32 %v952_v2, %v788_v62  ;;  %v1018_v12 = vadd.f32 %v954_v7, %v790_v1  ;;  %v1180_v20 = vsel %vm1097_vm10, %v1961_v10, 0.0  ;;  %v1182_v29 = vsel %vm1099_vm11, %v1961_v10, 0.0 }
  0x9f   : > { %vm484_vm13 = vcmp.eq.s32.totalorder %v1801_v42, %v1846_v6  ;;  %v565_v30 = vsel %vm482_vm12, %v1853_v11, 0.0  ;;  %vm646_vm14 = vcmp.eq.s32.totalorder %v1794_v35, %v1864_v21  ;;  %vm648_vm15 = vcmp.eq.s32.totalorder %v1801_v42, %v1864_v21 }
  0xa0   : > { %v1244_v33 = vadd.f32 %v1180_v20, %v1016_v8  ;;  %v1246_v34 = vadd.f32 %v1182_v29, %v1018_v12  ;;  %v567_v38 = vsel %vm484_vm13, %v1853_v11, 0.0  ;;  %v729_v39 = vsel %vm646_vm14, %v1867_v28, 0.0 }
  0xa1   : > { %v731_v40 = vsel %vm648_vm15, %v1867_v28, 0.0  ;;  %v793_v41 = vadd.f32 %v729_v39, %v565_v30  ;;  %vm874_vm0 = vcmp.eq.s32.totalorder %v1794_v35, %v1872_v36  ;;  %vm876_vm1 = vcmp.eq.s32.totalorder %v1801_v42, %v1872_v36 }
  0xa2   : > { %v1543_v44 = vpack.c.bf16 %v1246_v34, %v1244_v33  ;;  %v795_v4 = vadd.f32 %v731_v40, %v567_v38  ;;  %v957_v45 = vsel %vm874_vm0, %v1875_v37, 0.0  ;;  %v959_v46 = vsel %vm876_vm1, %v1875_v37, 0.0 }
  0xa3   : > { %v1021_v31 = vadd.f32 %v957_v45, %v793_v41  ;;  %vm1102_vm2 = vcmp.eq.s32.totalorder %v1794_v35, %v1894_v15  ;;  %vm1104_vm3 = vcmp.eq.s32.totalorder %v1801_v42, %v1894_v15  ;;  %vm481_vm4 = vcmp.eq.s32.totalorder %v1794_v35, %v1908_v56 }
  0xa4   : > { %1544 = vmatpush1.bf16.msra.mxu0 %v1543_v44  ;;  %v1023_v32 = vadd.f32 %v959_v46, %v795_v4  ;;  %v1185_v14 = vsel %vm1102_vm2, %v1897_v17, 0.0  ;;  %v1187_v47 = vsel %vm1104_vm3, %v1897_v17, 0.0  ;;  %vm483_vm5 = vcmp.eq.s32.totalorder %v1801_v42, %v1908_v56 }
  0xa5   : > { %v1249_v48 = vadd.f32 %v1185_v14, %v1021_v31  ;;  %v564_v51 = vsel %vm481_vm4, %v1911_v58, 0.0  ;;  %v566_v26 = vsel %vm483_vm5, %v1911_v58, 0.0  ;;  %vm645_vm6 = vcmp.eq.s32.totalorder %v1794_v35, %v1916_v63 }
  0xa6   : > { %v1251_v27 = vadd.f32 %v1187_v47, %v1023_v32  ;;  %vm647_vm7 = vcmp.eq.s32.totalorder %v1801_v42, %v1916_v63  ;;  %v728_v16 = vsel %vm645_vm6, %v1919_v0, 0.0  ;;  %vm873_vm8 = vcmp.eq.s32.totalorder %v1794_v35, %v1940_v43 }
  0xa7   : > { %v730_v52 = vsel %vm647_vm7, %v1919_v0, 0.0  ;;  %v792_v53 = vadd.f32 %v728_v16, %v564_v51  ;;  %vm875_vm9 = vcmp.eq.s32.totalorder %v1801_v42, %v1940_v43  ;;  %v956_v55 = vsel %vm873_vm8, %v1949_v3, 0.0 }
  0xa8   : > { %v1545_v24 = vpack.c.bf16 %v1251_v27, %v1249_v48  ;;  %v794_v25 = vadd.f32 %v730_v52, %v566_v26  ;;  %v958_v22 = vsel %vm875_vm9, %v1949_v3, 0.0  ;;  %vm1101_vm10 = vcmp.eq.s32.totalorder %v1794_v35, %v1952_v5 }
  0xa9   : > { %v1020_v23 = vadd.f32 %v956_v55, %v792_v53  ;;  %vm1103_vm11 = vcmp.eq.s32.totalorder %v1801_v42, %v1952_v5  ;;  %v1184_v18 = vsel %vm1101_vm10, %v1961_v10, 0.0  ;;  %vm486_vm12 = vcmp.eq.s32.totalorder %v1810_v49, %v1846_v6 }
  0xaa   : > { %1546 = vmatprep.subr.bf16.mxu0 %v1545_v24  ;;  %v1022_v19 = vadd.f32 %v958_v22, %v794_v25  ;;  %v1186_v13 = vsel %vm1103_vm11, %v1961_v10, 0.0  ;;  %vm488_vm13 = vcmp.eq.s32.totalorder %v1813_v50, %v1846_v6  ;;  %v569_v57 = vsel %vm486_vm12, %v1853_v11, 0.0 }
  0xab   : > { %v1248_v62 = vadd.f32 %v1184_v18, %v1020_v23  ;;  %v571_v35 = vsel %vm488_vm13, %v1853_v11, 0.0  ;;  %vm650_vm14 = vcmp.eq.s32.totalorder %v1810_v49, %v1864_v21  ;;  %vm652_vm15 = vcmp.eq.s32.totalorder %v1813_v50, %v1864_v21 }
  0xac   : > { %v1250_v42 = vadd.f32 %v1186_v13, %v1022_v19  ;;  %v733_v1 = vsel %vm650_vm14, %v1867_v28, 0.0  ;;  %v735_v2 = vsel %vm652_vm15, %v1867_v28, 0.0  ;;  %vm878_vm0 = vcmp.eq.s32.totalorder %v1810_v49, %v1872_v36 }
  0xad   : > { %v797_v7 = vadd.f32 %v733_v1, %v569_v57  ;;  %v799_v8 = vadd.f32 %v735_v2, %v571_v35  ;;  %vm880_vm1 = vcmp.eq.s32.totalorder %v1813_v50, %v1872_v36  ;;  %v961_v12 = vsel %vm878_vm0, %v1875_v37, 0.0 }
  0xae   : > { %v1547_v20 = vpack.c.bf16 %v1250_v42, %v1248_v62  ;;  %v963_v29 = vsel %vm880_vm1, %v1875_v37, 0.0  ;;  %vm1106_vm2 = vcmp.eq.s32.totalorder %v1810_v49, %v1894_v15  ;;  %vm1108_vm3 = vcmp.eq.s32.totalorder %v1813_v50, %v1894_v15 }
  0xaf   : > { %v1025_v30 = vadd.f32 %v961_v12, %v797_v7  ;;  %v1027_v33 = vadd.f32 %v963_v29, %v799_v8  ;;  %v1189_v34 = vsel %vm1106_vm2, %v1897_v17, 0.0  ;;  %v1191_v38 = vsel %vm1108_vm3, %v1897_v17, 0.0 }
  0xb0   : > { %1548 = vmatpush1.bf16.msra.mxu0 %v1547_v20  ;;  %vm485_vm4 = vcmp.eq.s32.totalorder %v1810_v49, %v1908_v56  ;;  %vm487_vm5 = vcmp.eq.s32.totalorder %v1813_v50, %v1908_v56  ;;  %vm649_vm6 = vcmp.eq.s32.totalorder %v1810_v49, %v1916_v63  ;;  %vm651_vm7 = vcmp.eq.s32.totalorder %v1813_v50, %v1916_v63 }
  0xb1   : > { %v1253_v39 = vadd.f32 %v1189_v34, %v1025_v30  ;;  %v1255_v40 = vadd.f32 %v1191_v38, %v1027_v33  ;;  %v568_v41 = vsel %vm485_vm4, %v1911_v58, 0.0  ;;  %v570_v44 = vsel %vm487_vm5, %v1911_v58, 0.0 }
  0xb2   : > { %v732_v4 = vsel %vm649_vm6, %v1919_v0, 0.0  ;;  %v734_v45 = vsel %vm651_vm7, %v1919_v0, 0.0  ;;  %vm877_vm8 = vcmp.eq.s32.totalorder %v1810_v49, %v1940_v43  ;;  %vm879_vm9 = vcmp.eq.s32.totalorder %v1813_v50, %v1940_v43 }
  0xb3   : > { %v1549_v46 = vpack.c.bf16 %v1255_v40, %v1253_v39  ;;  %v796_v31 = vadd.f32 %v732_v4, %v568_v41  ;;  %v798_v32 = vadd.f32 %v734_v45, %v570_v44  ;;  %v960_v14 = vsel %vm877_vm8, %v1949_v3, 0.0 }
  0xb4   : > { %v962_v47 = vsel %vm879_vm9, %v1949_v3, 0.0  ;;  %vm1105_vm10 = vcmp.eq.s32.totalorder %v1810_v49, %v1952_v5  ;;  %vm1107_vm11 = vcmp.eq.s32.totalorder %v1813_v50, %v1952_v5  ;;  %vm490_vm12 = vcmp.eq.s32.totalorder %v1818_v54, %v1846_v6 }
  0xb5   : > { %1550 = vmatprep.subr.bf16.mxu0 %v1549_v46  ;;  %v1024_v48 = vadd.f32 %v960_v14, %v796_v31  ;;  %v1026_v51 = vadd.f32 %v962_v47, %v798_v32  ;;  %v1188_v26 = vsel %vm1105_vm10, %v1961_v10, 0.0  ;;  %v1190_v27 = vsel %vm1107_vm11, %v1961_v10, 0.0 }
  0xb6   : > { %vm492_vm13 = vcmp.eq.s32.totalorder %v1823_v59, %v1846_v6  ;;  %v573_v16 = vsel %vm490_vm12, %v1853_v11, 0.0  ;;  %vm654_vm14 = vcmp.eq.s32.totalorder %v1818_v54, %v1864_v21  ;;  %vm656_vm15 = vcmp.eq.s32.totalorder %v1823_v59, %v1864_v21 }
  0xb7   : > { %v1252_v49 = vadd.f32 %v1188_v26, %v1024_v48  ;;  %v1254_v50 = vadd.f32 %v1190_v27, %v1026_v51  ;;  %v575_v52 = vsel %vm492_vm13, %v1853_v11, 0.0  ;;  %v737_v53 = vsel %vm654_vm14, %v1867_v28, 0.0 }
  0xb8   : > { %v739_v55 = vsel %vm656_vm15, %v1867_v28, 0.0  ;;  %v801_v24 = vadd.f32 %v737_v53, %v573_v16  ;;  %vm882_vm0 = vcmp.eq.s32.totalorder %v1818_v54, %v1872_v36  ;;  %vm884_vm1 = vcmp.eq.s32.totalorder %v1823_v59, %v1872_v36 }
  0xb9   : > { %v1551_v25 = vpack.c.bf16 %v1254_v50, %v1252_v49  ;;  %v803_v22 = vadd.f32 %v739_v55, %v575_v52  ;;  %v965_v23 = vsel %vm882_vm0, %v1875_v37, 0.0  ;;  %v967_v18 = vsel %vm884_vm1, %v1875_v37, 0.0 }
  0xba   : > { %v1029_v19 = vadd.f32 %v965_v23, %v801_v24  ;;  %vm1110_vm2 = vcmp.eq.s32.totalorder %v1818_v54, %v1894_v15  ;;  %vm1112_vm3 = vcmp.eq.s32.totalorder %v1823_v59, %v1894_v15  ;;  %vm489_vm4 = vcmp.eq.s32.totalorder %v1818_v54, %v1908_v56 }
  0xbb   : > { %1552 = vmatpush1.bf16.msra.mxu0 %v1551_v25  ;;  %v1031_v13 = vadd.f32 %v967_v18, %v803_v22  ;;  %v1193_v57 = vsel %vm1110_vm2, %v1897_v17, 0.0  ;;  %v1195_v62 = vsel %vm1112_vm3, %v1897_v17, 0.0  ;;  %vm491_vm5 = vcmp.eq.s32.totalorder %v1823_v59, %v1908_v56 }
  0xbc   : > { %v1257_v35 = vadd.f32 %v1193_v57, %v1029_v19  ;;  %v572_v42 = vsel %vm489_vm4, %v1911_v58, 0.0  ;;  %v574_v1 = vsel %vm491_vm5, %v1911_v58, 0.0  ;;  %vm653_vm6 = vcmp.eq.s32.totalorder %v1818_v54, %v1916_v63 }
  0xbd   : > { %v1259_v2 = vadd.f32 %v1195_v62, %v1031_v13  ;;  %vm655_vm7 = vcmp.eq.s32.totalorder %v1823_v59, %v1916_v63  ;;  %v736_v7 = vsel %vm653_vm6, %v1919_v0, 0.0  ;;  %vm881_vm8 = vcmp.eq.s32.totalorder %v1818_v54, %v1940_v43 }
  0xbe   : > { %v738_v8 = vsel %vm655_vm7, %v1919_v0, 0.0  ;;  %v800_v12 = vadd.f32 %v736_v7, %v572_v42  ;;  %vm883_vm9 = vcmp.eq.s32.totalorder %v1823_v59, %v1940_v43  ;;  %v964_v20 = vsel %vm881_vm8, %v1949_v3, 0.0 }
  0xbf   : > { %v1553_v29 = vpack.c.bf16 %v1259_v2, %v1257_v35  ;;  %v802_v30 = vadd.f32 %v738_v8, %v574_v1  ;;  %v966_v33 = vsel %vm883_vm9, %v1949_v3, 0.0  ;;  %vm1109_vm10 = vcmp.eq.s32.totalorder %v1818_v54, %v1952_v5 }
  0xc0   : > { %v1028_v34 = vadd.f32 %v964_v20, %v800_v12  ;;  %vm1111_vm11 = vcmp.eq.s32.totalorder %v1823_v59, %v1952_v5  ;;  %v1192_v38 = vsel %vm1109_vm10, %v1961_v10, 0.0  ;;  %vm494_vm12 = vcmp.eq.s32.totalorder %v1826_v60, %v1846_v6 }
  0xc1   : > { %1554 = vmatprep.subr.bf16.mxu0 %v1553_v29  ;;  %v1030_v39 = vadd.f32 %v966_v33, %v802_v30  ;;  %v1194_v40 = vsel %vm1111_vm11, %v1961_v10, 0.0  ;;  %vm496_vm13 = vcmp.eq.s32.totalorder %v1829_v61, %v1846_v6  ;;  %v577_v41 = vsel %vm494_vm12, %v1853_v11, 0.0 }
  0xc2   : > { %v1256_v44 = vadd.f32 %v1192_v38, %v1028_v34  ;;  %v579_v54 = vsel %vm496_vm13, %v1853_v11, 0.0  ;;  %vm658_vm14 = vcmp.eq.s32.totalorder %v1826_v60, %v1864_v21  ;;  %vm660_vm15 = vcmp.eq.s32.totalorder %v1829_v61, %v1864_v21 }
  0xc3   : > { %v1258_v59 = vadd.f32 %v1194_v40, %v1030_v39  ;;  %v741_v4 = vsel %vm658_vm14, %v1867_v28, 0.0  ;;  %v743_v45 = vsel %vm660_vm15, %v1867_v28, 0.0  ;;  %vm886_vm0 = vcmp.eq.s32.totalorder %v1826_v60, %v1872_v36 }
  0xc4   : > { %v805_v46 = vadd.f32 %v741_v4, %v577_v41  ;;  %v807_v31 = vadd.f32 %v743_v45, %v579_v54  ;;  %vm888_vm1 = vcmp.eq.s32.totalorder %v1829_v61, %v1872_v36  ;;  %v969_v32 = vsel %vm886_vm0, %v1875_v37, 0.0 }
  0xc5   : > { %v1555_v14 = vpack.c.bf16 %v1258_v59, %v1256_v44  ;;  %v971_v47 = vsel %vm888_vm1, %v1875_v37, 0.0  ;;  %vm1114_vm2 = vcmp.eq.s32.totalorder %v1826_v60, %v1894_v15  ;;  %vm1116_vm3 = vcmp.eq.s32.totalorder %v1829_v61, %v1894_v15 }
  0xc6   : > { %v1033_v48 = vadd.f32 %v969_v32, %v805_v46  ;;  %v1035_v51 = vadd.f32 %v971_v47, %v807_v31  ;;  %v1197_v26 = vsel %vm1114_vm2, %v1897_v17, 0.0  ;;  %v1199_v27 = vsel %vm1116_vm3, %v1897_v17, 0.0 }
  0xc7   : > { %1556 = vmatpush1.bf16.msra.mxu0 %v1555_v14  ;;  %vm493_vm4 = vcmp.eq.s32.totalorder %v1826_v60, %v1908_v56  ;;  %vm495_vm5 = vcmp.eq.s32.totalorder %v1829_v61, %v1908_v56  ;;  %vm657_vm6 = vcmp.eq.s32.totalorder %v1826_v60, %v1916_v63  ;;  %vm659_vm7 = vcmp.eq.s32.totalorder %v1829_v61, %v1916_v63 }
  0xc8   : > { %v1261_v16 = vadd.f32 %v1197_v26, %v1033_v48  ;;  %v1263_v49 = vadd.f32 %v1199_v27, %v1035_v51  ;;  %v576_v50 = vsel %vm493_vm4, %v1911_v58, 0.0  ;;  %v578_v52 = vsel %vm495_vm5, %v1911_v58, 0.0 }
  0xc9   : > { %v740_v53 = vsel %vm657_vm6, %v1919_v0, 0.0  ;;  %v742_v55 = vsel %vm659_vm7, %v1919_v0, 0.0  ;;  %vm885_vm8 = vcmp.eq.s32.totalorder %v1826_v60, %v1940_v43  ;;  %vm887_vm9 = vcmp.eq.s32.totalorder %v1829_v61, %v1940_v43 }
  0xca   : > { %v1557_v24 = vpack.c.bf16 %v1263_v49, %v1261_v16  ;;  %v804_v25 = vadd.f32 %v740_v53, %v576_v50  ;;  %v806_v22 = vadd.f32 %v742_v55, %v578_v52  ;;  %v968_v23 = vsel %vm885_vm8, %v1949_v3, 0.0 }
  0xcb   : > { %v970_v18 = vsel %vm887_vm9, %v1949_v3, 0.0  ;;  %vm1113_vm10 = vcmp.eq.s32.totalorder %v1826_v60, %v1952_v5  ;;  %vm1115_vm11 = vcmp.eq.s32.totalorder %v1829_v61, %v1952_v5  ;;  %v427_v19 = vadd.s32 176, %v1740_v9 }
  0xcc   : > { %1558 = vmatprep.subr.bf16.mxu0 %v1557_v24  ;;  %v1032_v13 = vadd.f32 %v968_v23, %v804_v25  ;;  %v1034_v57 = vadd.f32 %v970_v18, %v806_v22  ;;  %v1196_v62 = vsel %vm1113_vm10, %v1961_v10, 0.0  ;;  %v1198_v35 = vsel %vm1115_vm11, %v1961_v10, 0.0 }
  0xcd   : > { %v428_v42 = vadd.s32 184, %v1740_v9  ;;  %vm498_vm12 = vcmp.eq.s32.totalorder %v427_v19, %v1846_v6  ;;  %vm662_vm13 = vcmp.eq.s32.totalorder %v427_v19, %v1864_v21  ;;  %vm890_vm14 = vcmp.eq.s32.totalorder %v427_v19, %v1872_v36 }
  0xce   : > { %v1260_v60 = vadd.f32 %v1196_v62, %v1032_v13  ;;  %v1262_v1 = vadd.f32 %v1198_v35, %v1034_v57  ;;  %v581_v61 = vsel %vm498_vm12, %v1853_v11, 0.0  ;;  %v745_v2 = vsel %vm662_vm13, %v1867_v28, 0.0 }
  0xcf   : > { %vm500_vm15 = vcmp.eq.s32.totalorder %v428_v42, %v1846_v6  ;;  %vm664_vm0 = vcmp.eq.s32.totalorder %v428_v42, %v1864_v21  ;;  %v809_v7 = vadd.f32 %v745_v2, %v581_v61  ;;  %vm892_vm1 = vcmp.eq.s32.totalorder %v428_v42, %v1872_v36 }
  0xd0   : > { %v1559_v8 = vpack.c.bf16 %v1262_v1, %v1260_v60  ;;  %v583_v12 = vsel %vm500_vm15, %v1853_v11, 0.0  ;;  %v747_v20 = vsel %vm664_vm0, %v1867_v28, 0.0  ;;  %v973_v29 = vsel %vm890_vm14, %v1875_v37, 0.0 }
  0xd1   : > { %v811_v30 = vadd.f32 %v747_v20, %v583_v12  ;;  %v975_v33 = vsel %vm892_vm1, %v1875_v37, 0.0  ;;  %v1037_v34 = vadd.f32 %v973_v29, %v809_v7  ;;  %vm1118_vm2 = vcmp.eq.s32.totalorder %v427_v19, %v1894_v15 }
  0xd2   : > { %1560 = vmatpush1.bf16.msra.mxu0 %v1559_v8  ;;  %vm1120_vm3 = vcmp.eq.s32.totalorder %v428_v42, %v1894_v15  ;;  %v1201_v38 = vsel %vm1118_vm2, %v1897_v17, 0.0  ;;  %vm497_vm4 = vcmp.eq.s32.totalorder %v427_v19, %v1908_v56  ;;  %vm499_vm5 = vcmp.eq.s32.totalorder %v428_v42, %v1908_v56 }
  0xd3   : > { %v1039_v39 = vadd.f32 %v975_v33, %v811_v30  ;;  %v1203_v40 = vsel %vm1120_vm3, %v1897_v17, 0.0  ;;  %v1265_v41 = vadd.f32 %v1201_v38, %v1037_v34  ;;  %v580_v44 = vsel %vm497_vm4, %v1911_v58, 0.0 }
  0xd4   : > { %v582_v54 = vsel %vm499_vm5, %v1911_v58, 0.0  ;;  %vm661_vm6 = vcmp.eq.s32.totalorder %v427_v19, %v1916_v63  ;;  %vm663_vm7 = vcmp.eq.s32.totalorder %v428_v42, %v1916_v63  ;;  %vm889_vm8 = vcmp.eq.s32.totalorder %v427_v19, %v1940_v43 }
  0xd5   : > { %v1267_v59 = vadd.f32 %v1203_v40, %v1039_v39  ;;  %v744_v4 = vsel %vm661_vm6, %v1919_v0, 0.0  ;;  %v746_v45 = vsel %vm663_vm7, %v1919_v0, 0.0  ;;  %vm891_vm9 = vcmp.eq.s32.totalorder %v428_v42, %v1940_v43 }
  0xd6   : > { %v808_v46 = vadd.f32 %v744_v4, %v580_v44  ;;  %v810_v31 = vadd.f32 %v746_v45, %v582_v54  ;;  %v972_v32 = vsel %vm889_vm8, %v1949_v3, 0.0  ;;  %v974_v14 = vsel %vm891_vm9, %v1949_v3, 0.0 }
  0xd7   : > { %v1561_v47 = vpack.c.bf16 %v1267_v59, %v1265_v41  ;;  %vm1117_vm10 = vcmp.eq.s32.totalorder %v427_v19, %v1952_v5  ;;  %vm1119_vm11 = vcmp.eq.s32.totalorder %v428_v42, %v1952_v5  ;;  %v429_v48 = vadd.s32 192, %v1740_v9 }
  0xd8   : > { %v1036_v51 = vadd.f32 %v972_v32, %v808_v46  ;;  %v1038_v26 = vadd.f32 %v974_v14, %v810_v31  ;;  %v1200_v27 = vsel %vm1117_vm10, %v1961_v10, 0.0  ;;  %v1202_v16 = vsel %vm1119_vm11, %v1961_v10, 0.0 }
  0xd9   : > { %1562 = vmatprep.subr.bf16.mxu0 %v1561_v47  ;;  %v430_v49 = vadd.s32 200, %v1740_v9  ;;  %vm502_vm12 = vcmp.eq.s32.totalorder %v429_v48, %v1846_v6  ;;  %vm666_vm13 = vcmp.eq.s32.totalorder %v429_v48, %v1864_v21  ;;  %vm894_vm14 = vcmp.eq.s32.totalorder %v429_v48, %v1872_v36 }
  0xda   : > { %v1264_v50 = vadd.f32 %v1200_v27, %v1036_v51  ;;  %v1266_v52 = vadd.f32 %v1202_v16, %v1038_v26  ;;  %v585_v53 = vsel %vm502_vm12, %v1853_v11, 0.0  ;;  %v749_v55 = vsel %vm666_vm13, %v1867_v28, 0.0 }
  0xdb   : > { %vm504_vm15 = vcmp.eq.s32.totalorder %v430_v49, %v1846_v6  ;;  %vm668_vm0 = vcmp.eq.s32.totalorder %v430_v49, %v1864_v21  ;;  %v813_v24 = vadd.f32 %v749_v55, %v585_v53  ;;  %vm896_vm1 = vcmp.eq.s32.totalorder %v430_v49, %v1872_v36 }
  0xdc   : > { %v1563_v25 = vpack.c.bf16 %v1266_v52, %v1264_v50  ;;  %v587_v22 = vsel %vm504_vm15, %v1853_v11, 0.0  ;;  %v751_v23 = vsel %vm668_vm0, %v1867_v28, 0.0  ;;  %v977_v18 = vsel %vm894_vm14, %v1875_v37, 0.0 }
  0xdd   : > { %v815_v19 = vadd.f32 %v751_v23, %v587_v22  ;;  %v979_v13 = vsel %vm896_vm1, %v1875_v37, 0.0  ;;  %v1041_v57 = vadd.f32 %v977_v18, %v813_v24  ;;  %vm1122_vm2 = vcmp.eq.s32.totalorder %v429_v48, %v1894_v15 }
  0xde   : > { %1564 = vmatpush1.bf16.msra.mxu0 %v1563_v25  ;;  %vm1124_vm3 = vcmp.eq.s32.totalorder %v430_v49, %v1894_v15  ;;  %v1205_v62 = vsel %vm1122_vm2, %v1897_v17, 0.0  ;;  %vm501_vm4 = vcmp.eq.s32.totalorder %v429_v48, %v1908_v56  ;;  %vm503_vm5 = vcmp.eq.s32.totalorder %v430_v49, %v1908_v56 }
  0xdf   : > { %v1043_v35 = vadd.f32 %v979_v13, %v815_v19  ;;  %v1207_v42 = vsel %vm1124_vm3, %v1897_v17, 0.0  ;;  %v1269_v60 = vadd.f32 %v1205_v62, %v1041_v57  ;;  %v584_v1 = vsel %vm501_vm4, %v1911_v58, 0.0 }
  0xe0   : > { %v586_v61 = vsel %vm503_vm5, %v1911_v58, 0.0  ;;  %vm665_vm6 = vcmp.eq.s32.totalorder %v429_v48, %v1916_v63  ;;  %vm667_vm7 = vcmp.eq.s32.totalorder %v430_v49, %v1916_v63  ;;  %vm893_vm8 = vcmp.eq.s32.totalorder %v429_v48, %v1940_v43 }
  0xe1   : > { %v1271_v2 = vadd.f32 %v1207_v42, %v1043_v35  ;;  %v748_v7 = vsel %vm665_vm6, %v1919_v0, 0.0  ;;  %v750_v8 = vsel %vm667_vm7, %v1919_v0, 0.0  ;;  %vm895_vm9 = vcmp.eq.s32.totalorder %v430_v49, %v1940_v43 }
  0xe2   : > { %v812_v12 = vadd.f32 %v748_v7, %v584_v1  ;;  %v814_v20 = vadd.f32 %v750_v8, %v586_v61  ;;  %v976_v29 = vsel %vm893_vm8, %v1949_v3, 0.0  ;;  %v978_v30 = vsel %vm895_vm9, %v1949_v3, 0.0 }
  0xe3   : > { %v1565_v33 = vpack.c.bf16 %v1271_v2, %v1269_v60  ;;  %vm1121_vm10 = vcmp.eq.s32.totalorder %v429_v48, %v1952_v5  ;;  %vm1123_vm11 = vcmp.eq.s32.totalorder %v430_v49, %v1952_v5  ;;  %v431_v34 = vadd.s32 208, %v1740_v9 }
  0xe4   : > { %v1040_v38 = vadd.f32 %v976_v29, %v812_v12  ;;  %v1042_v39 = vadd.f32 %v978_v30, %v814_v20  ;;  %v1204_v40 = vsel %vm1121_vm10, %v1961_v10, 0.0  ;;  %v1206_v41 = vsel %vm1123_vm11, %v1961_v10, 0.0 }
  0xe5   : > { %1566 = vmatprep.subr.bf16.mxu0 %v1565_v33  ;;  %v432_v44 = vadd.s32 216, %v1740_v9  ;;  %vm506_vm12 = vcmp.eq.s32.totalorder %v431_v34, %v1846_v6  ;;  %vm670_vm13 = vcmp.eq.s32.totalorder %v431_v34, %v1864_v21  ;;  %vm898_vm14 = vcmp.eq.s32.totalorder %v431_v34, %v1872_v36 }
  0xe6   : > { %v1268_v54 = vadd.f32 %v1204_v40, %v1040_v38  ;;  %v1270_v59 = vadd.f32 %v1206_v41, %v1042_v39  ;;  %v589_v4 = vsel %vm506_vm12, %v1853_v11, 0.0  ;;  %v753_v45 = vsel %vm670_vm13, %v1867_v28, 0.0 }
  0xe7   : > { %vm508_vm15 = vcmp.eq.s32.totalorder %v432_v44, %v1846_v6  ;;  %vm672_vm0 = vcmp.eq.s32.totalorder %v432_v44, %v1864_v21  ;;  %v817_v46 = vadd.f32 %v753_v45, %v589_v4  ;;  %vm900_vm1 = vcmp.eq.s32.totalorder %v432_v44, %v1872_v36 }
  0xe8   : > { %v1567_v31 = vpack.c.bf16 %v1270_v59, %v1268_v54  ;;  %v591_v32 = vsel %vm508_vm15, %v1853_v11, 0.0  ;;  %v755_v14 = vsel %vm672_vm0, %v1867_v28, 0.0  ;;  %v981_v47 = vsel %vm898_vm14, %v1875_v37, 0.0 }
  0xe9   : > { %v819_v48 = vadd.f32 %v755_v14, %v591_v32  ;;  %v983_v51 = vsel %vm900_vm1, %v1875_v37, 0.0  ;;  %v1045_v26 = vadd.f32 %v981_v47, %v817_v46  ;;  %vm1126_vm2 = vcmp.eq.s32.totalorder %v431_v34, %v1894_v15 }
  0xea   : > { %1568 = vmatpush1.bf16.msra.mxu0 %v1567_v31  ;;  %vm1128_vm3 = vcmp.eq.s32.totalorder %v432_v44, %v1894_v15  ;;  %v1209_v27 = vsel %vm1126_vm2, %v1897_v17, 0.0  ;;  %vm505_vm4 = vcmp.eq.s32.totalorder %v431_v34, %v1908_v56  ;;  %vm507_vm5 = vcmp.eq.s32.totalorder %v432_v44, %v1908_v56 }
  0xeb   : > { %v1047_v16 = vadd.f32 %v983_v51, %v819_v48  ;;  %v1211_v49 = vsel %vm1128_vm3, %v1897_v17, 0.0  ;;  %v1273_v50 = vadd.f32 %v1209_v27, %v1045_v26  ;;  %v588_v52 = vsel %vm505_vm4, %v1911_v58, 0.0 }
  0xec   : > { %v590_v53 = vsel %vm507_vm5, %v1911_v58, 0.0  ;;  %vm669_vm6 = vcmp.eq.s32.totalorder %v431_v34, %v1916_v63  ;;  %vm671_vm7 = vcmp.eq.s32.totalorder %v432_v44, %v1916_v63  ;;  %vm897_vm8 = vcmp.eq.s32.totalorder %v431_v34, %v1940_v43 }
  0xed   : > { %v1275_v55 = vadd.f32 %v1211_v49, %v1047_v16  ;;  %v752_v24 = vsel %vm669_vm6, %v1919_v0, 0.0  ;;  %v754_v25 = vsel %vm671_vm7, %v1919_v0, 0.0  ;;  %vm899_vm9 = vcmp.eq.s32.totalorder %v432_v44, %v1940_v43 }
  0xee   : > { %v816_v22 = vadd.f32 %v752_v24, %v588_v52  ;;  %v818_v23 = vadd.f32 %v754_v25, %v590_v53  ;;  %v980_v18 = vsel %vm897_vm8, %v1949_v3, 0.0  ;;  %v982_v19 = vsel %vm899_vm9, %v1949_v3, 0.0 }
  0xef   : > { %v1569_v13 = vpack.c.bf16 %v1275_v55, %v1273_v50  ;;  %vm1125_vm10 = vcmp.eq.s32.totalorder %v431_v34, %v1952_v5  ;;  %vm1127_vm11 = vcmp.eq.s32.totalorder %v432_v44, %v1952_v5  ;;  %v433_v57 = vadd.s32 224, %v1740_v9 }
  0xf0   : > { %v1044_v62 = vadd.f32 %v980_v18, %v816_v22  ;;  %v1046_v35 = vadd.f32 %v982_v19, %v818_v23  ;;  %v1208_v42 = vsel %vm1125_vm10, %v1961_v10, 0.0  ;;  %v1210_v60 = vsel %vm1127_vm11, %v1961_v10, 0.0 }
  0xf1   : > { %1570 = vmatprep.subr.bf16.mxu0 %v1569_v13  ;;  %v434_v1 = vadd.s32 232, %v1740_v9  ;;  %vm510_vm12 = vcmp.eq.s32.totalorder %v433_v57, %v1846_v6  ;;  %vm674_vm13 = vcmp.eq.s32.totalorder %v433_v57, %v1864_v21  ;;  %vm902_vm14 = vcmp.eq.s32.totalorder %v433_v57, %v1872_v36 }
  0xf2   : > { %v1272_v61 = vadd.f32 %v1208_v42, %v1044_v62  ;;  %v1274_v2 = vadd.f32 %v1210_v60, %v1046_v35  ;;  %v593_v7 = vsel %vm510_vm12, %v1853_v11, 0.0  ;;  %v757_v8 = vsel %vm674_vm13, %v1867_v28, 0.0 }
  0xf3   : > { %vm512_vm15 = vcmp.eq.s32.totalorder %v434_v1, %v1846_v6  ;;  %vm676_vm0 = vcmp.eq.s32.totalorder %v434_v1, %v1864_v21  ;;  %v821_v12 = vadd.f32 %v757_v8, %v593_v7  ;;  %vm904_vm1 = vcmp.eq.s32.totalorder %v434_v1, %v1872_v36 }
  0xf4   : > { %v1571_v20 = vpack.c.bf16 %v1274_v2, %v1272_v61  ;;  %v595_v29 = vsel %vm512_vm15, %v1853_v11, 0.0  ;;  %v759_v30 = vsel %vm676_vm0, %v1867_v28, 0.0  ;;  %v985_v33 = vsel %vm902_vm14, %v1875_v37, 0.0 }
  0xf5   : > { %v823_v34 = vadd.f32 %v759_v30, %v595_v29  ;;  %v987_v38 = vsel %vm904_vm1, %v1875_v37, 0.0  ;;  %v1049_v39 = vadd.f32 %v985_v33, %v821_v12  ;;  %vm1130_vm2 = vcmp.eq.s32.totalorder %v433_v57, %v1894_v15  ;;  %v1284_v29 = vld [vmem:[%s1728_s17] sm:$0x77] }
  0xf6   : > { %1572 = vmatpush1.bf16.msra.mxu0 %v1571_v20  ;;  %vm1132_vm3 = vcmp.eq.s32.totalorder %v434_v1, %v1894_v15  ;;  %v1213_v40 = vsel %vm1130_vm2, %v1897_v17, 0.0  ;;  %vm509_vm4 = vcmp.eq.s32.totalorder %v433_v57, %v1908_v56  ;;  %vm511_vm5 = vcmp.eq.s32.totalorder %v434_v1, %v1908_v56 }
  0xf7   : > { %v1051_v41 = vadd.f32 %v987_v38, %v823_v34  ;;  %v1215_v44 = vsel %vm1132_vm3, %v1897_v17, 0.0  ;;  %v1277_v54 = vadd.f32 %v1213_v40, %v1049_v39  ;;  %v592_v59 = vsel %vm509_vm4, %v1911_v58, 0.0 }
  0xf8   : > { %v594_v4 = vsel %vm511_vm5, %v1911_v58, 0.0  ;;  %vm673_vm6 = vcmp.eq.s32.totalorder %v433_v57, %v1916_v63  ;;  %vm675_vm7 = vcmp.eq.s32.totalorder %v434_v1, %v1916_v63  ;;  %vm901_vm8 = vcmp.eq.s32.totalorder %v433_v57, %v1940_v43 }
  0xf9   : > { %v1279_v45 = vadd.f32 %v1215_v44, %v1051_v41  ;;  %v756_v46 = vsel %vm673_vm6, %v1919_v0, 0.0  ;;  %v758_v31 = vsel %vm675_vm7, %v1919_v0, 0.0  ;;  %vm903_vm9 = vcmp.eq.s32.totalorder %v434_v1, %v1940_v43 }
  0xfa   : > { %v820_v32 = vadd.f32 %v756_v46, %v592_v59  ;;  %v822_v14 = vadd.f32 %v758_v31, %v594_v4  ;;  %v984_v47 = vsel %vm901_vm8, %v1949_v3, 0.0  ;;  %v986_v48 = vsel %vm903_vm9, %v1949_v3, 0.0 }
  0xfb   : > { %v1573_v51 = vpack.c.bf16 %v1279_v45, %v1277_v54  ;;  %vm1129_vm10 = vcmp.eq.s32.totalorder %v433_v57, %v1952_v5  ;;  %vm1131_vm11 = vcmp.eq.s32.totalorder %v434_v1, %v1952_v5  ;;  %v435_v26 = vadd.s32 240, %v1740_v9 }
  0xfc   : > { %v1048_v27 = vadd.f32 %v984_v47, %v820_v32  ;;  %v1050_v16 = vadd.f32 %v986_v48, %v822_v14  ;;  %v1212_v49 = vsel %vm1129_vm10, %v1961_v10, 0.0  ;;  %v1214_v50 = vsel %vm1131_vm11, %v1961_v10, 0.0 }
  0xfd   : > { %1574 = vmatprep.subr.bf16.mxu0 %v1573_v51  ;;  %v436_v52 = vadd.s32 248, %v1740_v9  ;;  %vm514_vm12 = vcmp.eq.s32.totalorder %v435_v26, %v1846_v6  ;;  %vm678_vm13 = vcmp.eq.s32.totalorder %v435_v26, %v1864_v21  ;;  %vm906_vm14 = vcmp.eq.s32.totalorder %v435_v26, %v1872_v36 }
  0xfe   : > { %v1276_v53 = vadd.f32 %v1212_v49, %v1048_v27  ;;  %v1278_v55 = vadd.f32 %v1214_v50, %v1050_v16  ;;  %v597_v24 = vsel %vm514_vm12, %v1853_v11, 0.0  ;;  %v761_v25 = vsel %vm678_vm13, %v1867_v28, 0.0 }
  0xff   : > { %vm516_vm15 = vcmp.eq.s32.totalorder %v436_v52, %v1846_v6  ;;  %vm680_vm0 = vcmp.eq.s32.totalorder %v436_v52, %v1864_v21  ;;  %v825_v22 = vadd.f32 %v761_v25, %v597_v24  ;;  %vm908_vm1 = vcmp.eq.s32.totalorder %v436_v52, %v1872_v36 }
 0x100   : > { %v1575_v9 = vpack.c.bf16 %v1278_v55, %v1276_v53  ;;  %v599_v23 = vsel %vm516_vm15, %v1853_v11, 0.0  ;;  %v763_v18 = vsel %vm680_vm0, %v1867_v28, 0.0  ;;  %v989_v19 = vsel %vm906_vm14, %v1875_v37, 0.0 }
 0x101   : > { %v827_v13 = vadd.f32 %v763_v18, %v599_v23  ;;  %v991_v57 = vsel %vm908_vm1, %v1875_v37, 0.0  ;;  %v1053_v62 = vadd.f32 %v989_v19, %v825_v22  ;;  %vm1134_vm2 = vcmp.eq.s32.totalorder %v435_v26, %v1894_v15 }
 0x102   : > { %1576 = vmatpush1.bf16.msra.mxu0 %v1575_v9  ;;  %vm1136_vm3 = vcmp.eq.s32.totalorder %v436_v52, %v1894_v15  ;;  %v1217_v6 = vsel %vm1134_vm2, %v1897_v17, 0.0  ;;  %vm513_vm4 = vcmp.eq.s32.totalorder %v435_v26, %v1908_v56  ;;  %vm515_vm5 = vcmp.eq.s32.totalorder %v436_v52, %v1908_v56  ;;  %v348_v15 = vld [vmem:[%s1734_s26] sm:$0x77] }
 0x103   : > { %v1055_v11 = vadd.f32 %v991_v57, %v827_v13  ;;  %v1219_v21 = vsel %vm1136_vm3, %v1897_v17, 0.0  ;;  %v1281_v28 = vadd.f32 %v1217_v6, %v1053_v62  ;;  %v596_v36 = vsel %vm513_vm4, %v1911_v58, 0.0 }
 0x104   : > { %v598_v37 = vsel %vm515_vm5, %v1911_v58, 0.0  ;;  %vm677_vm6 = vcmp.eq.s32.totalorder %v435_v26, %v1916_v63  ;;  %vm679_vm7 = vcmp.eq.s32.totalorder %v436_v52, %v1916_v63  ;;  %vm905_vm8 = vcmp.eq.s32.totalorder %v435_v26, %v1940_v43 }
 0x105   : > { %v1283_v35 = vadd.f32 %v1219_v21, %v1055_v11  ;;  %v760_v42 = vsel %vm677_vm6, %v1919_v0, 0.0  ;;  %v762_v56 = vsel %vm679_vm7, %v1919_v0, 0.0  ;;  %vm907_vm9 = vcmp.eq.s32.totalorder %v436_v52, %v1940_v43 }
 0x106   : > { %v824_v17 = vadd.f32 %v760_v42, %v596_v36  ;;  %v826_v60 = vadd.f32 %v762_v56, %v598_v37  ;;  %v988_v1 = vsel %vm905_vm8, %v1949_v3, 0.0  ;;  %v990_v58 = vsel %vm907_vm9, %v1949_v3, 0.0 }
 0x107   : > { %v1577_v61 = vpack.c.bf16 %v1283_v35, %v1281_v28  ;;  %vm1133_vm10 = vcmp.eq.s32.totalorder %v435_v26, %v1952_v5  ;;  %vm1135_vm11 = vcmp.eq.s32.totalorder %v436_v52, %v1952_v5  ;;  %v1286_v63 = vcombine.high %v348_v15, %v348_v15 }
 0x108   : > { %v1052_v2 = vadd.f32 %v988_v1, %v824_v17  ;;  %v1054_v7 = vadd.f32 %v990_v58, %v826_v60  ;;  %v1216_v0 = vsel %vm1133_vm10, %v1961_v10, 0.0  ;;  %v1218_v43 = vsel %vm1135_vm11, %v1961_v10, 0.0 }
 0x109   : > { %1578 = vmatprep.subr.bf16.mxu0 %v1577_v61  ;;  %1352 = vmatprep.mubr.f32.mxu0 %v1286_v63 }
 0x10a   : > { %v1280_v8 = vadd.f32 %v1216_v0, %v1052_v2  ;;  %v1282_v12 = vadd.f32 %v1218_v43, %v1054_v7 }
 0x10c   : > { %v1579_v20 = vpack.c.bf16 %v1282_v12, %v1280_v8 }
 0x10e   : > { %1580 = vmatpush1.bf16.msra.mxu0 %v1579_v20 }
 0x111   : > { %1353 = vmatmul.mubr.f32.vlgmr.msra.gmra.mrb[0].mxu0 %v348_v15 }
 0x1e4   : > { %v1354_v3 = vpop.f32.mrb[0].mxu0 }
 0x1e5   : > { %v1356_v30 = vpop.f32.mrb[1].mxu0 }
 0x1e6   : > { %v1361_v33 = vcombine.low %v1354_v3, %v1356_v30 }
 0x1e8   : > { %v1363_v5 = vadd.f32 %v1361_v33, %v1284_v29 }
 0x1ea   : > { %1364 = vst [vmem:[%s1728_s17] sm:$0x77] %v1363_v5 }
 0x1eb PF: > { %s25_s28 = sadd.s32 1, %s1660_s28   ;;  %s2637_s1 = smov %s1656_s27 }
 0x1ec   : > { %p22_p4 = scmp.ge.s32.totalorder %s25_s28, 4   ;;  %s2638_s27 = smov %s2640_s29 }
 0x1ee   :  { %24 = sbr.rel (!%p22_p4) target bundleno = 27 (0x1b), region = 76 }

</bundles_post_ra>
